<compile_context>
chip_gen: v6e
topology: v6e:2x2x1
jax: 0.10.0
libtpu: 0.0.40
codegen_flags: <defaults>
</compile_context>

<pallas_src>
import jax
import jax.numpy as jnp
from jax.experimental import pallas as pl
from jax.experimental.pallas import tpu as pltpu


def _make_fused_lstm_fc_kernel(L, T, Bp, H, has_rest):
    """Builds the fused multi-layer LSTM + Linear kernel for static (L, T, Bp, H)."""
    G = 4 * H
    total_steps = T + L - 1  # wavefront: layer l processes its time (t - l) at global step t

    # Bounded unroll: full unroll only for short loops, else largest divisor <= 8.
    if total_steps <= 32:
        unroll = total_steps
    else:
        unroll = 8
        while total_steps % unroll:
            unroll -= 1

    def kernel(*refs):
        if has_rest:
            (x_ref, wih0_ref, wihr_ref, whh_ref, b_ref,
             fcw_ref, fcb_ref, out_ref, gx_sc) = refs
        else:
            (x_ref, wih0_ref, whh_ref, b_ref,
             fcw_ref, fcb_ref, out_ref, gx_sc) = refs
            wihr_ref = None

        # ---- Hoisted layer-0 input projection: ONE 2-D GEMM over all timesteps.
        # x_ref: (T*Bp, D) bf16, wih0_ref: (D, 4H) bf16 -> gx_sc: (T*Bp, 4H) f32.
        gx_sc[...] = (jnp.dot(x_ref[...], wih0_ref[...],
                              preferred_element_type=jnp.float32)
                      + b_ref[0])

        def cell(gates, c_prev):
            # Full-vreg transcendentals: one sigmoid + one tanh on the whole (Bp, 4H) tile,
            # then slice per gate.  Sigmoid via exp + approx reciprocal (EUP slot is ~free).
            s = pl.reciprocal(1.0 + jnp.exp(-gates), approx=True)
            tg = jnp.tanh(gates)
            i_g = s[:, 0 * H:1 * H]
            f_g = s[:, 1 * H:2 * H]
            g_g = tg[:, 2 * H:3 * H]
            o_g = s[:, 3 * H:4 * H]
            c_new = f_g * c_prev + i_g * g_g
            h_new = o_g * jnp.tanh(c_new)
            return h_new, c_new

        def step(t, carry):
            # carry[l] = (h_l, c_l) in f32; all layers read the OLD carry (previous global
            # step), so they are mutually independent within one wavefront step.
            new_carry = []
            for l in range(L):
                h_l, c_l = carry[l]
                if l == 0:
                    t0 = jnp.minimum(t, T - 1)               # clamp the wavefront tail
                    row = pl.multiple_of(t0 * Bp, Bp)
                    gx = gx_sc[pl.ds(row, Bp), :]
                else:
                    # In-loop input projection of layer l; off layer-0's serial chain.
                    h_in = carry[l - 1][0]                   # layer l-1 output at time (t - l)
                    gx = (jnp.dot(h_in.astype(jnp.bfloat16), wihr_ref[l - 1],
                                  preferred_element_type=jnp.float32)
                          + b_ref[l])
                gates = gx + jnp.dot(h_l.astype(jnp.bfloat16), whh_ref[l],
                                     preferred_element_type=jnp.float32)
                h_new, c_new = cell(gates, c_l)
                if l > 0:
                    active = t >= l                          # layer l starts at global step l
                    h_new = jnp.where(active, h_new, h_l)
                    c_new = jnp.where(active, c_new, c_l)
                new_carry.append((h_new, c_new))
            return tuple(new_carry)

        zeros = jnp.zeros((Bp, H), jnp.float32)
        init = tuple((zeros, zeros) for _ in range(L))
        final = jax.lax.fori_loop(0, total_steps, step, init, unroll=unroll)
        h_last = final[L - 1][0]                             # last layer at time T-1

        # ---- Final Linear on the last timestep (== out[:, -1, :] @ W_fc^T + b_fc).
        out_ref[...] = (jnp.dot(h_last.astype(jnp.bfloat16), fcw_ref[...],
                                preferred_element_type=jnp.float32)
                        + fcb_ref[...]).astype(out_ref.dtype)

    return kernel


def _round_up(x, m):
    return ((x + m - 1) // m) * m


def init_lstm_model_params(key, input_dim, hidden_dim, layer_dim, output_dim):
    """PyTorch-style uniform(-1/sqrt(H), 1/sqrt(H)) init in kernel-friendly layout:
    all matmul weights pre-transposed and stored bf16, biases fused (b_ih + b_hh) in f32."""
    H = hidden_dim
    G = 4 * H
    k = 1.0 / (hidden_dim ** 0.5)

    def u(kk, shape):
        return jax.random.uniform(kk, shape, jnp.float32, -k, k)

    keys = jax.random.split(key, 4 * layer_dim + 2)
    it = iter(keys)

    wih_t, whh_t, bias = [], [], []
    for layer in range(layer_dim):
        d_in = input_dim if layer == 0 else H
        wih_t.append(u(next(it), (d_in, G)))                  # (d_in, 4H) pre-transposed
        whh_t.append(u(next(it), (H, G)))                     # (H, 4H)   pre-transposed
        b = u(next(it), (G,)) + u(next(it), (G,))             # fused b_ih + b_hh
        bias.append(b.reshape(1, G))

    params = {
        "wih0_t": wih_t[0].astype(jnp.bfloat16),              # (D, 4H)
        "whh_t": jnp.stack(whh_t).astype(jnp.bfloat16),       # (L, H, 4H)
        "bias": jnp.stack(bias),                              # (L, 1, 4H) f32
        "fc_w_t": u(next(it), (H, output_dim)).astype(jnp.bfloat16),   # (H, O)
        "fc_b": u(next(it), (output_dim,)).reshape(1, output_dim),     # (1, O) f32
    }
    if layer_dim > 1:
        # Layers 1..L-1 input weights; omitted entirely when layer_dim == 1 (no dead DMA).
        params["wihr_t"] = jnp.stack(wih_t[1:]).astype(jnp.bfloat16)   # (L-1, H, 4H)
    return params


def lstm_model_apply(x, params):
    """x: (B, T, input_dim) batch-first, as in the PyTorch module. Returns (B, output_dim)."""
    B, T, D = x.shape
    L, H, G = params["whh_t"].shape                           # G == 4H
    O = params["fc_w_t"].shape[1]
    has_rest = "wihr_t" in params
    Bp = _round_up(max(B, 8), 8)                              # sublane-aligned batch

    # Time-major, batch-padded, flattened to 2-D so the layer-0 projection is one GEMM.
    x_tm = jnp.transpose(x, (1, 0, 2))                        # (T, B, D)
    x_p = jnp.pad(x_tm, ((0, 0), (0, Bp - B), (0, 0)))        # padded rows are independent
    x2d = x_p.reshape(T * Bp, D).astype(jnp.bfloat16)         # (T*Bp, D) bf16 operand

    kernel = _make_fused_lstm_fc_kernel(L, T, Bp, H, has_rest)

    in_specs = [pl.BlockSpec((T * Bp, D), lambda: (0, 0)),
                pl.BlockSpec((D, G), lambda: (0, 0))]
    args = [x2d, params["wih0_t"]]
    if has_rest:
        Lr = params["wihr_t"].shape[0]
        in_specs.append(pl.BlockSpec((Lr, H, G), lambda: (0, 0, 0)))
        args.append(params["wihr_t"])
    in_specs += [pl.BlockSpec((L, H, G), lambda: (0, 0, 0)),
                 pl.BlockSpec((L, 1, G), lambda: (0, 0, 0)),
                 pl.BlockSpec((H, O), lambda: (0, 0)),
                 pl.BlockSpec((1, O), lambda: (0, 0))]
    args += [params["whh_t"], params["bias"], params["fc_w_t"], params["fc_b"]]

    # Explicit VMEM budget (inputs + weights + gx scratch, with margin for pipeline buffers).
    vmem_bytes = (T * Bp * D * 2 + T * Bp * G * 4
                  + (D * G + max(L - 1, 0) * H * G + L * H * G + H * O) * 2
                  + (L * G + O) * 4 + Bp * O * 4)
    vmem_limit = int(min(max(4 * vmem_bytes, 16 * 1024 * 1024), 100 * 1024 * 1024))

    out_p = pl.pallas_call(
        kernel,
        out_shape=jax.ShapeDtypeStruct((Bp, O), jnp.float32),
        in_specs=in_specs,
        out_specs=pl.BlockSpec((Bp, O), lambda: (0, 0)),
        scratch_shapes=[pltpu.VMEM((T * Bp, G), jnp.float32)],  # hoisted layer-0 gate proj.
        compiler_params=pltpu.CompilerParams(vmem_limit_bytes=vmem_limit),
    )(*args)

    return out_p[:B]


lstm_model_forward = jax.jit(lstm_model_apply)


if __name__ == "__main__":
    batch, seq_len = 2, 8
    input_dim, hidden_dim, layer_dim, output_dim = 4, 32, 2, 3
    dropout_prob = 0.2  # only active in PyTorch training mode; inference forward is identity

    key = jax.random.PRNGKey(0)
    key, xk = jax.random.split(key)
    x = jax.random.normal(xk, (batch, seq_len, input_dim), dtype=jnp.float32)

    params = init_lstm_model_params(key, input_dim, hidden_dim, layer_dim, output_dim)

    out = lstm_model_forward(x, params)
    out = jax.block_until_ready(out)
    assert out.shape == (batch, output_dim), out.shape
    assert bool(jnp.all(jnp.isfinite(out))), "non-finite output"
    print("KERNEL_OK")
</pallas_src>

<mosaic_0001>
module attributes {stable_mosaic.version = 11 : i64} {
  func.func @kernel(%arg0: memref<64x4xbf16, #tpu.memory_space<vmem>>, %arg1: memref<4x128xbf16, #tpu.memory_space<vmem>>, %arg2: memref<1x32x128xbf16, #tpu.memory_space<vmem>>, %arg3: memref<2x32x128xbf16, #tpu.memory_space<vmem>>, %arg4: memref<2x1x128xf32, #tpu.memory_space<vmem>>, %arg5: memref<32x3xbf16, #tpu.memory_space<vmem>>, %arg6: memref<1x3xf32, #tpu.memory_space<vmem>>, %arg7: memref<8x3xf32, #tpu.memory_space<vmem>>, %arg8: memref<64x128xf32, #tpu.memory_space<vmem>>) attributes {dimension_semantics = [], scalar_prefetch = 0 : i64, scratch_operands = 1 : i64, tpu.core_type = #tpu.core_type<tc>} {
    %c0 = arith.constant 0 : index
    %c0_0 = arith.constant 0 : index
    %0 = vector.load %arg0[%c0, %c0_0] : memref<64x4xbf16, #tpu.memory_space<vmem>>, vector<64x4xbf16>
    %c0_1 = arith.constant 0 : index
    %c0_2 = arith.constant 0 : index
    %1 = vector.load %arg1[%c0_1, %c0_2] : memref<4x128xbf16, #tpu.memory_space<vmem>>, vector<4x128xbf16>
    %cst = arith.constant dense<0.000000e+00> : vector<64x128xf32>
    %2 = tpu.matmul %0, %1, %cst {dimension_numbers = #tpu.dot_dimension_numbers<[1], [0], [0], [1], [0, 0, 1, 1], [], []>} : vector<64x4xbf16>, vector<4x128xbf16>, vector<64x128xf32> -> vector<64x128xf32>
    %c0_3 = arith.constant 0 : index
    %c0_4 = arith.constant 0 : index
    %c0_5 = arith.constant 0 : index
    %3 = vector.load %arg4[%c0_3, %c0_4, %c0_5] : memref<2x1x128xf32, #tpu.memory_space<vmem>>, vector<1x1x128xf32>
    %4 = vector.shape_cast %3 : vector<1x1x128xf32> to vector<1x128xf32>
    %5 = vector.broadcast %4 : vector<1x128xf32> to vector<64x128xf32>
    %6 = arith.addf %2, %5 : vector<64x128xf32>
    %c0_6 = arith.constant 0 : index
    %c0_7 = arith.constant 0 : index
    %7 = vector.load %arg8[%c0_6, %c0_7] : memref<64x128xf32, #tpu.memory_space<vmem>>, vector<64x128xf32>
    tpu.vector_store %arg8[%c0_6, %c0_7], %6 {strides = array<i32>} : memref<64x128xf32, #tpu.memory_space<vmem>>, vector<64x128xf32>,
    %cst_8 = arith.constant 0.000000e+00 : f32
    %8 = vector.broadcast %cst_8 : f32 to vector<8x32xf32>
    %c0_i32 = arith.constant 0 : i32
    %c7_i32 = arith.constant 7 : i32
    %9 = arith.minsi %c0_i32, %c7_i32 : i32
    %c8_i32 = arith.constant 8 : i32
    %10 = arith.muli %9, %c8_i32 : i32
    %11 = tpu.assume_multiple %10, 8 : i32
    %12 = arith.index_cast %11 : i32 to index
    %c0_9 = arith.constant 0 : index
    %13 = vector.load %arg8[%12, %c0_9] : memref<64x128xf32, #tpu.memory_space<vmem>>, vector<8x128xf32>
    %14 = arith.truncf %8 : vector<8x32xf32> to vector<8x32xbf16>
    %c0_10 = arith.constant 0 : index
    %c0_11 = arith.constant 0 : index
    %c0_12 = arith.constant 0 : index
    %15 = vector.load %arg3[%c0_10, %c0_11, %c0_12] : memref<2x32x128xbf16, #tpu.memory_space<vmem>>, vector<1x32x128xbf16>
    %16 = vector.shape_cast %15 : vector<1x32x128xbf16> to vector<32x128xbf16>
    %cst_13 = arith.constant dense<0.000000e+00> : vector<8x128xf32>
    %17 = tpu.matmul %14, %16, %cst_13 {dimension_numbers = #tpu.dot_dimension_numbers<[1], [0], [0], [1], [0, 0, 1, 1], [], []>} : vector<8x32xbf16>, vector<32x128xbf16>, vector<8x128xf32> -> vector<8x128xf32>
    %18 = arith.addf %13, %17 : vector<8x128xf32>
    %cst_14 = arith.constant 0.000000e+00 : f32
    %19 = vector.broadcast %cst_14 : f32 to vector<8x128xf32>
    %20 = arith.subf %19, %18 : vector<8x128xf32>
    %21 = math.exp %20 : vector<8x128xf32>
    %cst_15 = arith.constant 1.000000e+00 : f32
    %22 = vector.broadcast %cst_15 : f32 to vector<8x128xf32>
    %23 = arith.addf %22, %21 : vector<8x128xf32>
    %24 = tpu.reciprocal %23 {approx = true} : vector<8x128xf32> -> vector<8x128xf32>
    %25 = math.tanh %18 : vector<8x128xf32>
    %26 = vector.extract_strided_slice %24 {offsets = [0, 0], sizes = [8, 32], strides = [1, 1]} : vector<8x128xf32> to vector<8x32xf32>
    %27 = vector.extract_strided_slice %24 {offsets = [0, 32], sizes = [8, 32], strides = [1, 1]} : vector<8x128xf32> to vector<8x32xf32>
    %28 = vector.extract_strided_slice %25 {offsets = [0, 64], sizes = [8, 32], strides = [1, 1]} : vector<8x128xf32> to vector<8x32xf32>
    %29 = vector.extract_strided_slice %24 {offsets = [0, 96], sizes = [8, 32], strides = [1, 1]} : vector<8x128xf32> to vector<8x32xf32>
    %30 = arith.mulf %27, %8 : vector<8x32xf32>
    %31 = arith.mulf %26, %28 : vector<8x32xf32>
    %32 = arith.addf %30, %31 : vector<8x32xf32>
    %33 = math.tanh %32 : vector<8x32xf32>
    %34 = arith.mulf %29, %33 : vector<8x32xf32>
    %35 = arith.truncf %8 : vector<8x32xf32> to vector<8x32xbf16>
    %c0_16 = arith.constant 0 : index
    %c0_17 = arith.constant 0 : index
    %c0_18 = arith.constant 0 : index
    %36 = vector.load %arg2[%c0_16, %c0_17, %c0_18] : memref<1x32x128xbf16, #tpu.memory_space<vmem>>, vector<1x32x128xbf16>
    %37 = vector.shape_cast %36 : vector<1x32x128xbf16> to vector<32x128xbf16>
    %cst_19 = arith.constant dense<0.000000e+00> : vector<8x128xf32>
    %38 = tpu.matmul %35, %37, %cst_19 {dimension_numbers = #tpu.dot_dimension_numbers<[1], [0], [0], [1], [0, 0, 1, 1], [], []>} : vector<8x32xbf16>, vector<32x128xbf16>, vector<8x128xf32> -> vector<8x128xf32>
    %c1 = arith.constant 1 : index
    %c0_20 = arith.constant 0 : index
    %c0_21 = arith.constant 0 : index
    %39 = vector.load %arg4[%c1, %c0_20, %c0_21] : memref<2x1x128xf32, #tpu.memory_space<vmem>>, vector<1x1x128xf32>
    %40 = vector.shape_cast %39 : vector<1x1x128xf32> to vector<1x128xf32>
    %41 = vector.broadcast %40 : vector<1x128xf32> to vector<8x128xf32>
    %42 = arith.addf %38, %41 : vector<8x128xf32>
    %43 = arith.truncf %8 : vector<8x32xf32> to vector<8x32xbf16>
    %c1_22 = arith.constant 1 : index
    %c0_23 = arith.constant 0 : index
    %c0_24 = arith.constant 0 : index
    %44 = vector.load %arg3[%c1_22, %c0_23, %c0_24] : memref<2x32x128xbf16, #tpu.memory_space<vmem>>, vector<1x32x128xbf16>
    %45 = vector.shape_cast %44 : vector<1x32x128xbf16> to vector<32x128xbf16>
    %cst_25 = arith.constant dense<0.000000e+00> : vector<8x128xf32>
    %46 = tpu.matmul %43, %45, %cst_25 {dimension_numbers = #tpu.dot_dimension_numbers<[1], [0], [0], [1], [0, 0, 1, 1], [], []>} : vector<8x32xbf16>, vector<32x128xbf16>, vector<8x128xf32> -> vector<8x128xf32>
    %47 = arith.addf %42, %46 : vector<8x128xf32>
    %cst_26 = arith.constant 0.000000e+00 : f32
    %48 = vector.broadcast %cst_26 : f32 to vector<8x128xf32>
    %49 = arith.subf %48, %47 : vector<8x128xf32>
    %50 = math.exp %49 : vector<8x128xf32>
    %cst_27 = arith.constant 1.000000e+00 : f32
    %51 = vector.broadcast %cst_27 : f32 to vector<8x128xf32>
    %52 = arith.addf %51, %50 : vector<8x128xf32>
    %53 = tpu.reciprocal %52 {approx = true} : vector<8x128xf32> -> vector<8x128xf32>
    %54 = math.tanh %47 : vector<8x128xf32>
    %55 = vector.extract_strided_slice %53 {offsets = [0, 0], sizes = [8, 32], strides = [1, 1]} : vector<8x128xf32> to vector<8x32xf32>
    %56 = vector.extract_strided_slice %53 {offsets = [0, 32], sizes = [8, 32], strides = [1, 1]} : vector<8x128xf32> to vector<8x32xf32>
    %57 = vector.extract_strided_slice %54 {offsets = [0, 64], sizes = [8, 32], strides = [1, 1]} : vector<8x128xf32> to vector<8x32xf32>
    %58 = vector.extract_strided_slice %53 {offsets = [0, 96], sizes = [8, 32], strides = [1, 1]} : vector<8x128xf32> to vector<8x32xf32>
    %59 = arith.mulf %56, %8 : vector<8x32xf32>
    %60 = arith.mulf %55, %57 : vector<8x32xf32>
    %61 = arith.addf %59, %60 : vector<8x32xf32>
    %62 = math.tanh %61 : vector<8x32xf32>
    %63 = arith.mulf %58, %62 : vector<8x32xf32>
    %c1_i32 = arith.constant 1 : i32
    %64 = arith.cmpi sge, %c0_i32, %c1_i32 : i32
    %65 = arith.select %64, %63, %8 : vector<8x32xf32>
    %66 = arith.select %64, %61, %8 : vector<8x32xf32>
    %c1_i32_28 = arith.constant 1 : i32
    %c7_i32_29 = arith.constant 7 : i32
    %67 = arith.minsi %c1_i32_28, %c7_i32_29 : i32
    %c8_i32_30 = arith.constant 8 : i32
    %68 = arith.muli %67, %c8_i32_30 : i32
    %69 = tpu.assume_multiple %68, 8 : i32
    %70 = arith.index_cast %69 : i32 to index
    %c0_31 = arith.constant 0 : index
    %71 = vector.load %arg8[%70, %c0_31] : memref<64x128xf32, #tpu.memory_space<vmem>>, vector<8x128xf32>
    %72 = arith.truncf %34 : vector<8x32xf32> to vector<8x32xbf16>
    %c0_32 = arith.constant 0 : index
    %c0_33 = arith.constant 0 : index
    %c0_34 = arith.constant 0 : index
    %73 = vector.load %arg3[%c0_32, %c0_33, %c0_34] : memref<2x32x128xbf16, #tpu.memory_space<vmem>>, vector<1x32x128xbf16>
    %74 = vector.shape_cast %73 : vector<1x32x128xbf16> to vector<32x128xbf16>
    %cst_35 = arith.constant dense<0.000000e+00> : vector<8x128xf32>
    %75 = tpu.matmul %72, %74, %cst_35 {dimension_numbers = #tpu.dot_dimension_numbers<[1], [0], [0], [1], [0, 0, 1, 1], [], []>} : vector<8x32xbf16>, vector<32x128xbf16>, vector<8x128xf32> -> vector<8x128xf32>
    %76 = arith.addf %71, %75 : vector<8x128xf32>
    %cst_36 = arith.constant 0.000000e+00 : f32
    %77 = vector.broadcast %cst_36 : f32 to vector<8x128xf32>
    %78 = arith.subf %77, %76 : vector<8x128xf32>
    %79 = math.exp %78 : vector<8x128xf32>
    %cst_37 = arith.constant 1.000000e+00 : f32
    %80 = vector.broadcast %cst_37 : f32 to vector<8x128xf32>
    %81 = arith.addf %80, %79 : vector<8x128xf32>
    %82 = tpu.reciprocal %81 {approx = true} : vector<8x128xf32> -> vector<8x128xf32>
    %83 = math.tanh %76 : vector<8x128xf32>
    %84 = vector.extract_strided_slice %82 {offsets = [0, 0], sizes = [8, 32], strides = [1, 1]} : vector<8x128xf32> to vector<8x32xf32>
    %85 = vector.extract_strided_slice %82 {offsets = [0, 32], sizes = [8, 32], strides = [1, 1]} : vector<8x128xf32> to vector<8x32xf32>
    %86 = vector.extract_strided_slice %83 {offsets = [0, 64], sizes = [8, 32], strides = [1, 1]} : vector<8x128xf32> to vector<8x32xf32>
    %87 = vector.extract_strided_slice %82 {offsets = [0, 96], sizes = [8, 32], strides = [1, 1]} : vector<8x128xf32> to vector<8x32xf32>
    %88 = arith.mulf %85, %32 : vector<8x32xf32>
    %89 = arith.mulf %84, %86 : vector<8x32xf32>
    %90 = arith.addf %88, %89 : vector<8x32xf32>
    %91 = math.tanh %90 : vector<8x32xf32>
    %92 = arith.mulf %87, %91 : vector<8x32xf32>
    %93 = arith.truncf %34 : vector<8x32xf32> to vector<8x32xbf16>
    %c0_38 = arith.constant 0 : index
    %c0_39 = arith.constant 0 : index
    %c0_40 = arith.constant 0 : index
    %94 = vector.load %arg2[%c0_38, %c0_39, %c0_40] : memref<1x32x128xbf16, #tpu.memory_space<vmem>>, vector<1x32x128xbf16>
    %95 = vector.shape_cast %94 : vector<1x32x128xbf16> to vector<32x128xbf16>
    %cst_41 = arith.constant dense<0.000000e+00> : vector<8x128xf32>
    %96 = tpu.matmul %93, %95, %cst_41 {dimension_numbers = #tpu.dot_dimension_numbers<[1], [0], [0], [1], [0, 0, 1, 1], [], []>} : vector<8x32xbf16>, vector<32x128xbf16>, vector<8x128xf32> -> vector<8x128xf32>
    %c1_42 = arith.constant 1 : index
    %c0_43 = arith.constant 0 : index
    %c0_44 = arith.constant 0 : index
    %97 = vector.load %arg4[%c1_42, %c0_43, %c0_44] : memref<2x1x128xf32, #tpu.memory_space<vmem>>, vector<1x1x128xf32>
    %98 = vector.shape_cast %97 : vector<1x1x128xf32> to vector<1x128xf32>
    %99 = vector.broadcast %98 : vector<1x128xf32> to vector<8x128xf32>
    %100 = arith.addf %96, %99 : vector<8x128xf32>
    %101 = arith.truncf %65 : vector<8x32xf32> to vector<8x32xbf16>
    %c1_45 = arith.constant 1 : index
    %c0_46 = arith.constant 0 : index
    %c0_47 = arith.constant 0 : index
    %102 = vector.load %arg3[%c1_45, %c0_46, %c0_47] : memref<2x32x128xbf16, #tpu.memory_space<vmem>>, vector<1x32x128xbf16>
    %103 = vector.shape_cast %102 : vector<1x32x128xbf16> to vector<32x128xbf16>
    %cst_48 = arith.constant dense<0.000000e+00> : vector<8x128xf32>
    %104 = tpu.matmul %101, %103, %cst_48 {dimension_numbers = #tpu.dot_dimension_numbers<[1], [0], [0], [1], [0, 0, 1, 1], [], []>} : vector<8x32xbf16>, vector<32x128xbf16>, vector<8x128xf32> -> vector<8x128xf32>
    %105 = arith.addf %100, %104 : vector<8x128xf32>
    %cst_49 = arith.constant 0.000000e+00 : f32
    %106 = vector.broadcast %cst_49 : f32 to vector<8x128xf32>
    %107 = arith.subf %106, %105 : vector<8x128xf32>
    %108 = math.exp %107 : vector<8x128xf32>
    %cst_50 = arith.constant 1.000000e+00 : f32
    %109 = vector.broadcast %cst_50 : f32 to vector<8x128xf32>
    %110 = arith.addf %109, %108 : vector<8x128xf32>
    %111 = tpu.reciprocal %110 {approx = true} : vector<8x128xf32> -> vector<8x128xf32>
    %112 = math.tanh %105 : vector<8x128xf32>
    %113 = vector.extract_strided_slice %111 {offsets = [0, 0], sizes = [8, 32], strides = [1, 1]} : vector<8x128xf32> to vector<8x32xf32>
    %114 = vector.extract_strided_slice %111 {offsets = [0, 32], sizes = [8, 32], strides = [1, 1]} : vector<8x128xf32> to vector<8x32xf32>
    %115 = vector.extract_strided_slice %112 {offsets = [0, 64], sizes = [8, 32], strides = [1, 1]} : vector<8x128xf32> to vector<8x32xf32>
    %116 = vector.extract_strided_slice %111 {offsets = [0, 96], sizes = [8, 32], strides = [1, 1]} : vector<8x128xf32> to vector<8x32xf32>
    %117 = arith.mulf %114, %66 : vector<8x32xf32>
    %118 = arith.mulf %113, %115 : vector<8x32xf32>
    %119 = arith.addf %117, %118 : vector<8x32xf32>
    %120 = math.tanh %119 : vector<8x32xf32>
    %121 = arith.mulf %116, %120 : vector<8x32xf32>
    %c1_i32_51 = arith.constant 1 : i32
    %122 = arith.cmpi sge, %c1_i32_28, %c1_i32_51 : i32
    %123 = arith.select %122, %121, %65 : vector<8x32xf32>
    %124 = arith.select %122, %119, %66 : vector<8x32xf32>
    %c2_i32 = arith.constant 2 : i32
    %c7_i32_52 = arith.constant 7 : i32
    %125 = arith.minsi %c2_i32, %c7_i32_52 : i32
    %c8_i32_53 = arith.constant 8 : i32
    %126 = arith.muli %125, %c8_i32_53 : i32
    %127 = tpu.assume_multiple %126, 8 : i32
    %128 = arith.index_cast %127 : i32 to index
    %c0_54 = arith.constant 0 : index
    %129 = vector.load %arg8[%128, %c0_54] : memref<64x128xf32, #tpu.memory_space<vmem>>, vector<8x128xf32>
    %130 = arith.truncf %92 : vector<8x32xf32> to vector<8x32xbf16>
    %c0_55 = arith.constant 0 : index
    %c0_56 = arith.constant 0 : index
    %c0_57 = arith.constant 0 : index
    %131 = vector.load %arg3[%c0_55, %c0_56, %c0_57] : memref<2x32x128xbf16, #tpu.memory_space<vmem>>, vector<1x32x128xbf16>
    %132 = vector.shape_cast %131 : vector<1x32x128xbf16> to vector<32x128xbf16>
    %cst_58 = arith.constant dense<0.000000e+00> : vector<8x128xf32>
    %133 = tpu.matmul %130, %132, %cst_58 {dimension_numbers = #tpu.dot_dimension_numbers<[1], [0], [0], [1], [0, 0, 1, 1], [], []>} : vector<8x32xbf16>, vector<32x128xbf16>, vector<8x128xf32> -> vector<8x128xf32>
    %134 = arith.addf %129, %133 : vector<8x128xf32>
    %cst_59 = arith.constant 0.000000e+00 : f32
    %135 = vector.broadcast %cst_59 : f32 to vector<8x128xf32>
    %136 = arith.subf %135, %134 : vector<8x128xf32>
    %137 = math.exp %136 : vector<8x128xf32>
    %cst_60 = arith.constant 1.000000e+00 : f32
    %138 = vector.broadcast %cst_60 : f32 to vector<8x128xf32>
    %139 = arith.addf %138, %137 : vector<8x128xf32>
    %140 = tpu.reciprocal %139 {approx = true} : vector<8x128xf32> -> vector<8x128xf32>
    %141 = math.tanh %134 : vector<8x128xf32>
    %142 = vector.extract_strided_slice %140 {offsets = [0, 0], sizes = [8, 32], strides = [1, 1]} : vector<8x128xf32> to vector<8x32xf32>
    %143 = vector.extract_strided_slice %140 {offsets = [0, 32], sizes = [8, 32], strides = [1, 1]} : vector<8x128xf32> to vector<8x32xf32>
    %144 = vector.extract_strided_slice %141 {offsets = [0, 64], sizes = [8, 32], strides = [1, 1]} : vector<8x128xf32> to vector<8x32xf32>
    %145 = vector.extract_strided_slice %140 {offsets = [0, 96], sizes = [8, 32], strides = [1, 1]} : vector<8x128xf32> to vector<8x32xf32>
    %146 = arith.mulf %143, %90 : vector<8x32xf32>
    %147 = arith.mulf %142, %144 : vector<8x32xf32>
    %148 = arith.addf %146, %147 : vector<8x32xf32>
    %149 = math.tanh %148 : vector<8x32xf32>
    %150 = arith.mulf %145, %149 : vector<8x32xf32>
    %151 = arith.truncf %92 : vector<8x32xf32> to vector<8x32xbf16>
    %c0_61 = arith.constant 0 : index
    %c0_62 = arith.constant 0 : index
    %c0_63 = arith.constant 0 : index
    %152 = vector.load %arg2[%c0_61, %c0_62, %c0_63] : memref<1x32x128xbf16, #tpu.memory_space<vmem>>, vector<1x32x128xbf16>
    %153 = vector.shape_cast %152 : vector<1x32x128xbf16> to vector<32x128xbf16>
    %cst_64 = arith.constant dense<0.000000e+00> : vector<8x128xf32>
    %154 = tpu.matmul %151, %153, %cst_64 {dimension_numbers = #tpu.dot_dimension_numbers<[1], [0], [0], [1], [0, 0, 1, 1], [], []>} : vector<8x32xbf16>, vector<32x128xbf16>, vector<8x128xf32> -> vector<8x128xf32>
    %c1_65 = arith.constant 1 : index
    %c0_66 = arith.constant 0 : index
    %c0_67 = arith.constant 0 : index
    %155 = vector.load %arg4[%c1_65, %c0_66, %c0_67] : memref<2x1x128xf32, #tpu.memory_space<vmem>>, vector<1x1x128xf32>
    %156 = vector.shape_cast %155 : vector<1x1x128xf32> to vector<1x128xf32>
    %157 = vector.broadcast %156 : vector<1x128xf32> to vector<8x128xf32>
    %158 = arith.addf %154, %157 : vector<8x128xf32>
    %159 = arith.truncf %123 : vector<8x32xf32> to vector<8x32xbf16>
    %c1_68 = arith.constant 1 : index
    %c0_69 = arith.constant 0 : index
    %c0_70 = arith.constant 0 : index
    %160 = vector.load %arg3[%c1_68, %c0_69, %c0_70] : memref<2x32x128xbf16, #tpu.memory_space<vmem>>, vector<1x32x128xbf16>
    %161 = vector.shape_cast %160 : vector<1x32x128xbf16> to vector<32x128xbf16>
    %cst_71 = arith.constant dense<0.000000e+00> : vector<8x128xf32>
    %162 = tpu.matmul %159, %161, %cst_71 {dimension_numbers = #tpu.dot_dimension_numbers<[1], [0], [0], [1], [0, 0, 1, 1], [], []>} : vector<8x32xbf16>, vector<32x128xbf16>, vector<8x128xf32> -> vector<8x128xf32>
    %163 = arith.addf %158, %162 : vector<8x128xf32>
    %cst_72 = arith.constant 0.000000e+00 : f32
    %164 = vector.broadcast %cst_72 : f32 to vector<8x128xf32>
    %165 = arith.subf %164, %163 : vector<8x128xf32>
    %166 = math.exp %165 : vector<8x128xf32>
    %cst_73 = arith.constant 1.000000e+00 : f32
    %167 = vector.broadcast %cst_73 : f32 to vector<8x128xf32>
    %168 = arith.addf %167, %166 : vector<8x128xf32>
    %169 = tpu.reciprocal %168 {approx = true} : vector<8x128xf32> -> vector<8x128xf32>
    %170 = math.tanh %163 : vector<8x128xf32>
    %171 = vector.extract_strided_slice %169 {offsets = [0, 0], sizes = [8, 32], strides = [1, 1]} : vector<8x128xf32> to vector<8x32xf32>
    %172 = vector.extract_strided_slice %169 {offsets = [0, 32], sizes = [8, 32], strides = [1, 1]} : vector<8x128xf32> to vector<8x32xf32>
    %173 = vector.extract_strided_slice %170 {offsets = [0, 64], sizes = [8, 32], strides = [1, 1]} : vector<8x128xf32> to vector<8x32xf32>
    %174 = vector.extract_strided_slice %169 {offsets = [0, 96], sizes = [8, 32], strides = [1, 1]} : vector<8x128xf32> to vector<8x32xf32>
    %175 = arith.mulf %172, %124 : vector<8x32xf32>
    %176 = arith.mulf %171, %173 : vector<8x32xf32>
    %177 = arith.addf %175, %176 : vector<8x32xf32>
    %178 = math.tanh %177 : vector<8x32xf32>
    %179 = arith.mulf %174, %178 : vector<8x32xf32>
    %c1_i32_74 = arith.constant 1 : i32
    %180 = arith.cmpi sge, %c2_i32, %c1_i32_74 : i32
    %181 = arith.select %180, %179, %123 : vector<8x32xf32>
    %182 = arith.select %180, %177, %124 : vector<8x32xf32>
    %c3_i32 = arith.constant 3 : i32
    %c7_i32_75 = arith.constant 7 : i32
    %183 = arith.minsi %c3_i32, %c7_i32_75 : i32
    %c8_i32_76 = arith.constant 8 : i32
    %184 = arith.muli %183, %c8_i32_76 : i32
    %185 = tpu.assume_multiple %184, 8 : i32
    %186 = arith.index_cast %185 : i32 to index
    %c0_77 = arith.constant 0 : index
    %187 = vector.load %arg8[%186, %c0_77] : memref<64x128xf32, #tpu.memory_space<vmem>>, vector<8x128xf32>
    %188 = arith.truncf %150 : vector<8x32xf32> to vector<8x32xbf16>
    %c0_78 = arith.constant 0 : index
    %c0_79 = arith.constant 0 : index
    %c0_80 = arith.constant 0 : index
    %189 = vector.load %arg3[%c0_78, %c0_79, %c0_80] : memref<2x32x128xbf16, #tpu.memory_space<vmem>>, vector<1x32x128xbf16>
    %190 = vector.shape_cast %189 : vector<1x32x128xbf16> to vector<32x128xbf16>
    %cst_81 = arith.constant dense<0.000000e+00> : vector<8x128xf32>
    %191 = tpu.matmul %188, %190, %cst_81 {dimension_numbers = #tpu.dot_dimension_numbers<[1], [0], [0], [1], [0, 0, 1, 1], [], []>} : vector<8x32xbf16>, vector<32x128xbf16>, vector<8x128xf32> -> vector<8x128xf32>
    %192 = arith.addf %187, %191 : vector<8x128xf32>
    %cst_82 = arith.constant 0.000000e+00 : f32
    %193 = vector.broadcast %cst_82 : f32 to vector<8x128xf32>
    %194 = arith.subf %193, %192 : vector<8x128xf32>
    %195 = math.exp %194 : vector<8x128xf32>
    %cst_83 = arith.constant 1.000000e+00 : f32
    %196 = vector.broadcast %cst_83 : f32 to vector<8x128xf32>
    %197 = arith.addf %196, %195 : vector<8x128xf32>
    %198 = tpu.reciprocal %197 {approx = true} : vector<8x128xf32> -> vector<8x128xf32>
    %199 = math.tanh %192 : vector<8x128xf32>
    %200 = vector.extract_strided_slice %198 {offsets = [0, 0], sizes = [8, 32], strides = [1, 1]} : vector<8x128xf32> to vector<8x32xf32>
    %201 = vector.extract_strided_slice %198 {offsets = [0, 32], sizes = [8, 32], strides = [1, 1]} : vector<8x128xf32> to vector<8x32xf32>
    %202 = vector.extract_strided_slice %199 {offsets = [0, 64], sizes = [8, 32], strides = [1, 1]} : vector<8x128xf32> to vector<8x32xf32>
    %203 = vector.extract_strided_slice %198 {offsets = [0, 96], sizes = [8, 32], strides = [1, 1]} : vector<8x128xf32> to vector<8x32xf32>
    %204 = arith.mulf %201, %148 : vector<8x32xf32>
    %205 = arith.mulf %200, %202 : vector<8x32xf32>
    %206 = arith.addf %204, %205 : vector<8x32xf32>
    %207 = math.tanh %206 : vector<8x32xf32>
    %208 = arith.mulf %203, %207 : vector<8x32xf32>
    %209 = arith.truncf %150 : vector<8x32xf32> to vector<8x32xbf16>
    %c0_84 = arith.constant 0 : index
    %c0_85 = arith.constant 0 : index
    %c0_86 = arith.constant 0 : index
    %210 = vector.load %arg2[%c0_84, %c0_85, %c0_86] : memref<1x32x128xbf16, #tpu.memory_space<vmem>>, vector<1x32x128xbf16>
    %211 = vector.shape_cast %210 : vector<1x32x128xbf16> to vector<32x128xbf16>
    %cst_87 = arith.constant dense<0.000000e+00> : vector<8x128xf32>
    %212 = tpu.matmul %209, %211, %cst_87 {dimension_numbers = #tpu.dot_dimension_numbers<[1], [0], [0], [1], [0, 0, 1, 1], [], []>} : vector<8x32xbf16>, vector<32x128xbf16>, vector<8x128xf32> -> vector<8x128xf32>
    %c1_88 = arith.constant 1 : index
    %c0_89 = arith.constant 0 : index
    %c0_90 = arith.constant 0 : index
    %213 = vector.load %arg4[%c1_88, %c0_89, %c0_90] : memref<2x1x128xf32, #tpu.memory_space<vmem>>, vector<1x1x128xf32>
    %214 = vector.shape_cast %213 : vector<1x1x128xf32> to vector<1x128xf32>
    %215 = vector.broadcast %214 : vector<1x128xf32> to vector<8x128xf32>
    %216 = arith.addf %212, %215 : vector<8x128xf32>
    %217 = arith.truncf %181 : vector<8x32xf32> to vector<8x32xbf16>
    %c1_91 = arith.constant 1 : index
    %c0_92 = arith.constant 0 : index
    %c0_93 = arith.constant 0 : index
    %218 = vector.load %arg3[%c1_91, %c0_92, %c0_93] : memref<2x32x128xbf16, #tpu.memory_space<vmem>>, vector<1x32x128xbf16>
    %219 = vector.shape_cast %218 : vector<1x32x128xbf16> to vector<32x128xbf16>
    %cst_94 = arith.constant dense<0.000000e+00> : vector<8x128xf32>
    %220 = tpu.matmul %217, %219, %cst_94 {dimension_numbers = #tpu.dot_dimension_numbers<[1], [0], [0], [1], [0, 0, 1, 1], [], []>} : vector<8x32xbf16>, vector<32x128xbf16>, vector<8x128xf32> -> vector<8x128xf32>
    %221 = arith.addf %216, %220 : vector<8x128xf32>
    %cst_95 = arith.constant 0.000000e+00 : f32
    %222 = vector.broadcast %cst_95 : f32 to vector<8x128xf32>
    %223 = arith.subf %222, %221 : vector<8x128xf32>
    %224 = math.exp %223 : vector<8x128xf32>
    %cst_96 = arith.constant 1.000000e+00 : f32
    %225 = vector.broadcast %cst_96 : f32 to vector<8x128xf32>
    %226 = arith.addf %225, %224 : vector<8x128xf32>
    %227 = tpu.reciprocal %226 {approx = true} : vector<8x128xf32> -> vector<8x128xf32>
    %228 = math.tanh %221 : vector<8x128xf32>
    %229 = vector.extract_strided_slice %227 {offsets = [0, 0], sizes = [8, 32], strides = [1, 1]} : vector<8x128xf32> to vector<8x32xf32>
    %230 = vector.extract_strided_slice %227 {offsets = [0, 32], sizes = [8, 32], strides = [1, 1]} : vector<8x128xf32> to vector<8x32xf32>
    %231 = vector.extract_strided_slice %228 {offsets = [0, 64], sizes = [8, 32], strides = [1, 1]} : vector<8x128xf32> to vector<8x32xf32>
    %232 = vector.extract_strided_slice %227 {offsets = [0, 96], sizes = [8, 32], strides = [1, 1]} : vector<8x128xf32> to vector<8x32xf32>
    %233 = arith.mulf %230, %182 : vector<8x32xf32>
    %234 = arith.mulf %229, %231 : vector<8x32xf32>
    %235 = arith.addf %233, %234 : vector<8x32xf32>
    %236 = math.tanh %235 : vector<8x32xf32>
    %237 = arith.mulf %232, %236 : vector<8x32xf32>
    %c1_i32_97 = arith.constant 1 : i32
    %238 = arith.cmpi sge, %c3_i32, %c1_i32_97 : i32
    %239 = arith.select %238, %237, %181 : vector<8x32xf32>
    %240 = arith.select %238, %235, %182 : vector<8x32xf32>
    %c4_i32 = arith.constant 4 : i32
    %c7_i32_98 = arith.constant 7 : i32
    %241 = arith.minsi %c4_i32, %c7_i32_98 : i32
    %c8_i32_99 = arith.constant 8 : i32
    %242 = arith.muli %241, %c8_i32_99 : i32
    %243 = tpu.assume_multiple %242, 8 : i32
    %244 = arith.index_cast %243 : i32 to index
    %c0_100 = arith.constant 0 : index
    %245 = vector.load %arg8[%244, %c0_100] : memref<64x128xf32, #tpu.memory_space<vmem>>, vector<8x128xf32>
    %246 = arith.truncf %208 : vector<8x32xf32> to vector<8x32xbf16>
    %c0_101 = arith.constant 0 : index
    %c0_102 = arith.constant 0 : index
    %c0_103 = arith.constant 0 : index
    %247 = vector.load %arg3[%c0_101, %c0_102, %c0_103] : memref<2x32x128xbf16, #tpu.memory_space<vmem>>, vector<1x32x128xbf16>
    %248 = vector.shape_cast %247 : vector<1x32x128xbf16> to vector<32x128xbf16>
    %cst_104 = arith.constant dense<0.000000e+00> : vector<8x128xf32>
    %249 = tpu.matmul %246, %248, %cst_104 {dimension_numbers = #tpu.dot_dimension_numbers<[1], [0], [0], [1], [0, 0, 1, 1], [], []>} : vector<8x32xbf16>, vector<32x128xbf16>, vector<8x128xf32> -> vector<8x128xf32>
    %250 = arith.addf %245, %249 : vector<8x128xf32>
    %cst_105 = arith.constant 0.000000e+00 : f32
    %251 = vector.broadcast %cst_105 : f32 to vector<8x128xf32>
    %252 = arith.subf %251, %250 : vector<8x128xf32>
    %253 = math.exp %252 : vector<8x128xf32>
    %cst_106 = arith.constant 1.000000e+00 : f32
    %254 = vector.broadcast %cst_106 : f32 to vector<8x128xf32>
    %255 = arith.addf %254, %253 : vector<8x128xf32>
    %256 = tpu.reciprocal %255 {approx = true} : vector<8x128xf32> -> vector<8x128xf32>
    %257 = math.tanh %250 : vector<8x128xf32>
    %258 = vector.extract_strided_slice %256 {offsets = [0, 0], sizes = [8, 32], strides = [1, 1]} : vector<8x128xf32> to vector<8x32xf32>
    %259 = vector.extract_strided_slice %256 {offsets = [0, 32], sizes = [8, 32], strides = [1, 1]} : vector<8x128xf32> to vector<8x32xf32>
    %260 = vector.extract_strided_slice %257 {offsets = [0, 64], sizes = [8, 32], strides = [1, 1]} : vector<8x128xf32> to vector<8x32xf32>
    %261 = vector.extract_strided_slice %256 {offsets = [0, 96], sizes = [8, 32], strides = [1, 1]} : vector<8x128xf32> to vector<8x32xf32>
    %262 = arith.mulf %259, %206 : vector<8x32xf32>
    %263 = arith.mulf %258, %260 : vector<8x32xf32>
    %264 = arith.addf %262, %263 : vector<8x32xf32>
    %265 = math.tanh %264 : vector<8x32xf32>
    %266 = arith.mulf %261, %265 : vector<8x32xf32>
    %267 = arith.truncf %208 : vector<8x32xf32> to vector<8x32xbf16>
    %c0_107 = arith.constant 0 : index
    %c0_108 = arith.constant 0 : index
    %c0_109 = arith.constant 0 : index
    %268 = vector.load %arg2[%c0_107, %c0_108, %c0_109] : memref<1x32x128xbf16, #tpu.memory_space<vmem>>, vector<1x32x128xbf16>
    %269 = vector.shape_cast %268 : vector<1x32x128xbf16> to vector<32x128xbf16>
    %cst_110 = arith.constant dense<0.000000e+00> : vector<8x128xf32>
    %270 = tpu.matmul %267, %269, %cst_110 {dimension_numbers = #tpu.dot_dimension_numbers<[1], [0], [0], [1], [0, 0, 1, 1], [], []>} : vector<8x32xbf16>, vector<32x128xbf16>, vector<8x128xf32> -> vector<8x128xf32>
    %c1_111 = arith.constant 1 : index
    %c0_112 = arith.constant 0 : index
    %c0_113 = arith.constant 0 : index
    %271 = vector.load %arg4[%c1_111, %c0_112, %c0_113] : memref<2x1x128xf32, #tpu.memory_space<vmem>>, vector<1x1x128xf32>
    %272 = vector.shape_cast %271 : vector<1x1x128xf32> to vector<1x128xf32>
    %273 = vector.broadcast %272 : vector<1x128xf32> to vector<8x128xf32>
    %274 = arith.addf %270, %273 : vector<8x128xf32>
    %275 = arith.truncf %239 : vector<8x32xf32> to vector<8x32xbf16>
    %c1_114 = arith.constant 1 : index
    %c0_115 = arith.constant 0 : index
    %c0_116 = arith.constant 0 : index
    %276 = vector.load %arg3[%c1_114, %c0_115, %c0_116] : memref<2x32x128xbf16, #tpu.memory_space<vmem>>, vector<1x32x128xbf16>
    %277 = vector.shape_cast %276 : vector<1x32x128xbf16> to vector<32x128xbf16>
    %cst_117 = arith.constant dense<0.000000e+00> : vector<8x128xf32>
    %278 = tpu.matmul %275, %277, %cst_117 {dimension_numbers = #tpu.dot_dimension_numbers<[1], [0], [0], [1], [0, 0, 1, 1], [], []>} : vector<8x32xbf16>, vector<32x128xbf16>, vector<8x128xf32> -> vector<8x128xf32>
    %279 = arith.addf %274, %278 : vector<8x128xf32>
    %cst_118 = arith.constant 0.000000e+00 : f32
    %280 = vector.broadcast %cst_118 : f32 to vector<8x128xf32>
    %281 = arith.subf %280, %279 : vector<8x128xf32>
    %282 = math.exp %281 : vector<8x128xf32>
    %cst_119 = arith.constant 1.000000e+00 : f32
    %283 = vector.broadcast %cst_119 : f32 to vector<8x128xf32>
    %284 = arith.addf %283, %282 : vector<8x128xf32>
    %285 = tpu.reciprocal %284 {approx = true} : vector<8x128xf32> -> vector<8x128xf32>
    %286 = math.tanh %279 : vector<8x128xf32>
    %287 = vector.extract_strided_slice %285 {offsets = [0, 0], sizes = [8, 32], strides = [1, 1]} : vector<8x128xf32> to vector<8x32xf32>
    %288 = vector.extract_strided_slice %285 {offsets = [0, 32], sizes = [8, 32], strides = [1, 1]} : vector<8x128xf32> to vector<8x32xf32>
    %289 = vector.extract_strided_slice %286 {offsets = [0, 64], sizes = [8, 32], strides = [1, 1]} : vector<8x128xf32> to vector<8x32xf32>
    %290 = vector.extract_strided_slice %285 {offsets = [0, 96], sizes = [8, 32], strides = [1, 1]} : vector<8x128xf32> to vector<8x32xf32>
    %291 = arith.mulf %288, %240 : vector<8x32xf32>
    %292 = arith.mulf %287, %289 : vector<8x32xf32>
    %293 = arith.addf %291, %292 : vector<8x32xf32>
    %294 = math.tanh %293 : vector<8x32xf32>
    %295 = arith.mulf %290, %294 : vector<8x32xf32>
    %c1_i32_120 = arith.constant 1 : i32
    %296 = arith.cmpi sge, %c4_i32, %c1_i32_120 : i32
    %297 = arith.select %296, %295, %239 : vector<8x32xf32>
    %298 = arith.select %296, %293, %240 : vector<8x32xf32>
    %c5_i32 = arith.constant 5 : i32
    %c7_i32_121 = arith.constant 7 : i32
    %299 = arith.minsi %c5_i32, %c7_i32_121 : i32
    %c8_i32_122 = arith.constant 8 : i32
    %300 = arith.muli %299, %c8_i32_122 : i32
    %301 = tpu.assume_multiple %300, 8 : i32
    %302 = arith.index_cast %301 : i32 to index
    %c0_123 = arith.constant 0 : index
    %303 = vector.load %arg8[%302, %c0_123] : memref<64x128xf32, #tpu.memory_space<vmem>>, vector<8x128xf32>
    %304 = arith.truncf %266 : vector<8x32xf32> to vector<8x32xbf16>
    %c0_124 = arith.constant 0 : index
    %c0_125 = arith.constant 0 : index
    %c0_126 = arith.constant 0 : index
    %305 = vector.load %arg3[%c0_124, %c0_125, %c0_126] : memref<2x32x128xbf16, #tpu.memory_space<vmem>>, vector<1x32x128xbf16>
    %306 = vector.shape_cast %305 : vector<1x32x128xbf16> to vector<32x128xbf16>
    %cst_127 = arith.constant dense<0.000000e+00> : vector<8x128xf32>
    %307 = tpu.matmul %304, %306, %cst_127 {dimension_numbers = #tpu.dot_dimension_numbers<[1], [0], [0], [1], [0, 0, 1, 1], [], []>} : vector<8x32xbf16>, vector<32x128xbf16>, vector<8x128xf32> -> vector<8x128xf32>
    %308 = arith.addf %303, %307 : vector<8x128xf32>
    %cst_128 = arith.constant 0.000000e+00 : f32
    %309 = vector.broadcast %cst_128 : f32 to vector<8x128xf32>
    %310 = arith.subf %309, %308 : vector<8x128xf32>
    %311 = math.exp %310 : vector<8x128xf32>
    %cst_129 = arith.constant 1.000000e+00 : f32
    %312 = vector.broadcast %cst_129 : f32 to vector<8x128xf32>
    %313 = arith.addf %312, %311 : vector<8x128xf32>
    %314 = tpu.reciprocal %313 {approx = true} : vector<8x128xf32> -> vector<8x128xf32>
    %315 = math.tanh %308 : vector<8x128xf32>
    %316 = vector.extract_strided_slice %314 {offsets = [0, 0], sizes = [8, 32], strides = [1, 1]} : vector<8x128xf32> to vector<8x32xf32>
    %317 = vector.extract_strided_slice %314 {offsets = [0, 32], sizes = [8, 32], strides = [1, 1]} : vector<8x128xf32> to vector<8x32xf32>
    %318 = vector.extract_strided_slice %315 {offsets = [0, 64], sizes = [8, 32], strides = [1, 1]} : vector<8x128xf32> to vector<8x32xf32>
    %319 = vector.extract_strided_slice %314 {offsets = [0, 96], sizes = [8, 32], strides = [1, 1]} : vector<8x128xf32> to vector<8x32xf32>
    %320 = arith.mulf %317, %264 : vector<8x32xf32>
    %321 = arith.mulf %316, %318 : vector<8x32xf32>
    %322 = arith.addf %320, %321 : vector<8x32xf32>
    %323 = math.tanh %322 : vector<8x32xf32>
    %324 = arith.mulf %319, %323 : vector<8x32xf32>
    %325 = arith.truncf %266 : vector<8x32xf32> to vector<8x32xbf16>
    %c0_130 = arith.constant 0 : index
    %c0_131 = arith.constant 0 : index
    %c0_132 = arith.constant 0 : index
    %326 = vector.load %arg2[%c0_130, %c0_131, %c0_132] : memref<1x32x128xbf16, #tpu.memory_space<vmem>>, vector<1x32x128xbf16>
    %327 = vector.shape_cast %326 : vector<1x32x128xbf16> to vector<32x128xbf16>
    %cst_133 = arith.constant dense<0.000000e+00> : vector<8x128xf32>
    %328 = tpu.matmul %325, %327, %cst_133 {dimension_numbers = #tpu.dot_dimension_numbers<[1], [0], [0], [1], [0, 0, 1, 1], [], []>} : vector<8x32xbf16>, vector<32x128xbf16>, vector<8x128xf32> -> vector<8x128xf32>
    %c1_134 = arith.constant 1 : index
    %c0_135 = arith.constant 0 : index
    %c0_136 = arith.constant 0 : index
    %329 = vector.load %arg4[%c1_134, %c0_135, %c0_136] : memref<2x1x128xf32, #tpu.memory_space<vmem>>, vector<1x1x128xf32>
    %330 = vector.shape_cast %329 : vector<1x1x128xf32> to vector<1x128xf32>
    %331 = vector.broadcast %330 : vector<1x128xf32> to vector<8x128xf32>
    %332 = arith.addf %328, %331 : vector<8x128xf32>
    %333 = arith.truncf %297 : vector<8x32xf32> to vector<8x32xbf16>
    %c1_137 = arith.constant 1 : index
    %c0_138 = arith.constant 0 : index
    %c0_139 = arith.constant 0 : index
    %334 = vector.load %arg3[%c1_137, %c0_138, %c0_139] : memref<2x32x128xbf16, #tpu.memory_space<vmem>>, vector<1x32x128xbf16>
    %335 = vector.shape_cast %334 : vector<1x32x128xbf16> to vector<32x128xbf16>
    %cst_140 = arith.constant dense<0.000000e+00> : vector<8x128xf32>
    %336 = tpu.matmul %333, %335, %cst_140 {dimension_numbers = #tpu.dot_dimension_numbers<[1], [0], [0], [1], [0, 0, 1, 1], [], []>} : vector<8x32xbf16>, vector<32x128xbf16>, vector<8x128xf32> -> vector<8x128xf32>
    %337 = arith.addf %332, %336 : vector<8x128xf32>
    %cst_141 = arith.constant 0.000000e+00 : f32
    %338 = vector.broadcast %cst_141 : f32 to vector<8x128xf32>
    %339 = arith.subf %338, %337 : vector<8x128xf32>
    %340 = math.exp %339 : vector<8x128xf32>
    %cst_142 = arith.constant 1.000000e+00 : f32
    %341 = vector.broadcast %cst_142 : f32 to vector<8x128xf32>
    %342 = arith.addf %341, %340 : vector<8x128xf32>
    %343 = tpu.reciprocal %342 {approx = true} : vector<8x128xf32> -> vector<8x128xf32>
    %344 = math.tanh %337 : vector<8x128xf32>
    %345 = vector.extract_strided_slice %343 {offsets = [0, 0], sizes = [8, 32], strides = [1, 1]} : vector<8x128xf32> to vector<8x32xf32>
    %346 = vector.extract_strided_slice %343 {offsets = [0, 32], sizes = [8, 32], strides = [1, 1]} : vector<8x128xf32> to vector<8x32xf32>
    %347 = vector.extract_strided_slice %344 {offsets = [0, 64], sizes = [8, 32], strides = [1, 1]} : vector<8x128xf32> to vector<8x32xf32>
    %348 = vector.extract_strided_slice %343 {offsets = [0, 96], sizes = [8, 32], strides = [1, 1]} : vector<8x128xf32> to vector<8x32xf32>
    %349 = arith.mulf %346, %298 : vector<8x32xf32>
    %350 = arith.mulf %345, %347 : vector<8x32xf32>
    %351 = arith.addf %349, %350 : vector<8x32xf32>
    %352 = math.tanh %351 : vector<8x32xf32>
    %353 = arith.mulf %348, %352 : vector<8x32xf32>
    %c1_i32_143 = arith.constant 1 : i32
    %354 = arith.cmpi sge, %c5_i32, %c1_i32_143 : i32
    %355 = arith.select %354, %353, %297 : vector<8x32xf32>
    %356 = arith.select %354, %351, %298 : vector<8x32xf32>
    %c6_i32 = arith.constant 6 : i32
    %c7_i32_144 = arith.constant 7 : i32
    %357 = arith.minsi %c6_i32, %c7_i32_144 : i32
    %c8_i32_145 = arith.constant 8 : i32
    %358 = arith.muli %357, %c8_i32_145 : i32
    %359 = tpu.assume_multiple %358, 8 : i32
    %360 = arith.index_cast %359 : i32 to index
    %c0_146 = arith.constant 0 : index
    %361 = vector.load %arg8[%360, %c0_146] : memref<64x128xf32, #tpu.memory_space<vmem>>, vector<8x128xf32>
    %362 = arith.truncf %324 : vector<8x32xf32> to vector<8x32xbf16>
    %c0_147 = arith.constant 0 : index
    %c0_148 = arith.constant 0 : index
    %c0_149 = arith.constant 0 : index
    %363 = vector.load %arg3[%c0_147, %c0_148, %c0_149] : memref<2x32x128xbf16, #tpu.memory_space<vmem>>, vector<1x32x128xbf16>
    %364 = vector.shape_cast %363 : vector<1x32x128xbf16> to vector<32x128xbf16>
    %cst_150 = arith.constant dense<0.000000e+00> : vector<8x128xf32>
    %365 = tpu.matmul %362, %364, %cst_150 {dimension_numbers = #tpu.dot_dimension_numbers<[1], [0], [0], [1], [0, 0, 1, 1], [], []>} : vector<8x32xbf16>, vector<32x128xbf16>, vector<8x128xf32> -> vector<8x128xf32>
    %366 = arith.addf %361, %365 : vector<8x128xf32>
    %cst_151 = arith.constant 0.000000e+00 : f32
    %367 = vector.broadcast %cst_151 : f32 to vector<8x128xf32>
    %368 = arith.subf %367, %366 : vector<8x128xf32>
    %369 = math.exp %368 : vector<8x128xf32>
    %cst_152 = arith.constant 1.000000e+00 : f32
    %370 = vector.broadcast %cst_152 : f32 to vector<8x128xf32>
    %371 = arith.addf %370, %369 : vector<8x128xf32>
    %372 = tpu.reciprocal %371 {approx = true} : vector<8x128xf32> -> vector<8x128xf32>
    %373 = math.tanh %366 : vector<8x128xf32>
    %374 = vector.extract_strided_slice %372 {offsets = [0, 0], sizes = [8, 32], strides = [1, 1]} : vector<8x128xf32> to vector<8x32xf32>
    %375 = vector.extract_strided_slice %372 {offsets = [0, 32], sizes = [8, 32], strides = [1, 1]} : vector<8x128xf32> to vector<8x32xf32>
    %376 = vector.extract_strided_slice %373 {offsets = [0, 64], sizes = [8, 32], strides = [1, 1]} : vector<8x128xf32> to vector<8x32xf32>
    %377 = vector.extract_strided_slice %372 {offsets = [0, 96], sizes = [8, 32], strides = [1, 1]} : vector<8x128xf32> to vector<8x32xf32>
    %378 = arith.mulf %375, %322 : vector<8x32xf32>
    %379 = arith.mulf %374, %376 : vector<8x32xf32>
    %380 = arith.addf %378, %379 : vector<8x32xf32>
    %381 = math.tanh %380 : vector<8x32xf32>
    %382 = arith.mulf %377, %381 : vector<8x32xf32>
    %383 = arith.truncf %324 : vector<8x32xf32> to vector<8x32xbf16>
    %c0_153 = arith.constant 0 : index
    %c0_154 = arith.constant 0 : index
    %c0_155 = arith.constant 0 : index
    %384 = vector.load %arg2[%c0_153, %c0_154, %c0_155] : memref<1x32x128xbf16, #tpu.memory_space<vmem>>, vector<1x32x128xbf16>
    %385 = vector.shape_cast %384 : vector<1x32x128xbf16> to vector<32x128xbf16>
    %cst_156 = arith.constant dense<0.000000e+00> : vector<8x128xf32>
    %386 = tpu.matmul %383, %385, %cst_156 {dimension_numbers = #tpu.dot_dimension_numbers<[1], [0], [0], [1], [0, 0, 1, 1], [], []>} : vector<8x32xbf16>, vector<32x128xbf16>, vector<8x128xf32> -> vector<8x128xf32>
    %c1_157 = arith.constant 1 : index
    %c0_158 = arith.constant 0 : index
    %c0_159 = arith.constant 0 : index
    %387 = vector.load %arg4[%c1_157, %c0_158, %c0_159] : memref<2x1x128xf32, #tpu.memory_space<vmem>>, vector<1x1x128xf32>
    %388 = vector.shape_cast %387 : vector<1x1x128xf32> to vector<1x128xf32>
    %389 = vector.broadcast %388 : vector<1x128xf32> to vector<8x128xf32>
    %390 = arith.addf %386, %389 : vector<8x128xf32>
    %391 = arith.truncf %355 : vector<8x32xf32> to vector<8x32xbf16>
    %c1_160 = arith.constant 1 : index
    %c0_161 = arith.constant 0 : index
    %c0_162 = arith.constant 0 : index
    %392 = vector.load %arg3[%c1_160, %c0_161, %c0_162] : memref<2x32x128xbf16, #tpu.memory_space<vmem>>, vector<1x32x128xbf16>
    %393 = vector.shape_cast %392 : vector<1x32x128xbf16> to vector<32x128xbf16>
    %cst_163 = arith.constant dense<0.000000e+00> : vector<8x128xf32>
    %394 = tpu.matmul %391, %393, %cst_163 {dimension_numbers = #tpu.dot_dimension_numbers<[1], [0], [0], [1], [0, 0, 1, 1], [], []>} : vector<8x32xbf16>, vector<32x128xbf16>, vector<8x128xf32> -> vector<8x128xf32>
    %395 = arith.addf %390, %394 : vector<8x128xf32>
    %cst_164 = arith.constant 0.000000e+00 : f32
    %396 = vector.broadcast %cst_164 : f32 to vector<8x128xf32>
    %397 = arith.subf %396, %395 : vector<8x128xf32>
    %398 = math.exp %397 : vector<8x128xf32>
    %cst_165 = arith.constant 1.000000e+00 : f32
    %399 = vector.broadcast %cst_165 : f32 to vector<8x128xf32>
    %400 = arith.addf %399, %398 : vector<8x128xf32>
    %401 = tpu.reciprocal %400 {approx = true} : vector<8x128xf32> -> vector<8x128xf32>
    %402 = math.tanh %395 : vector<8x128xf32>
    %403 = vector.extract_strided_slice %401 {offsets = [0, 0], sizes = [8, 32], strides = [1, 1]} : vector<8x128xf32> to vector<8x32xf32>
    %404 = vector.extract_strided_slice %401 {offsets = [0, 32], sizes = [8, 32], strides = [1, 1]} : vector<8x128xf32> to vector<8x32xf32>
    %405 = vector.extract_strided_slice %402 {offsets = [0, 64], sizes = [8, 32], strides = [1, 1]} : vector<8x128xf32> to vector<8x32xf32>
    %406 = vector.extract_strided_slice %401 {offsets = [0, 96], sizes = [8, 32], strides = [1, 1]} : vector<8x128xf32> to vector<8x32xf32>
    %407 = arith.mulf %404, %356 : vector<8x32xf32>
    %408 = arith.mulf %403, %405 : vector<8x32xf32>
    %409 = arith.addf %407, %408 : vector<8x32xf32>
    %410 = math.tanh %409 : vector<8x32xf32>
    %411 = arith.mulf %406, %410 : vector<8x32xf32>
    %c1_i32_166 = arith.constant 1 : i32
    %412 = arith.cmpi sge, %c6_i32, %c1_i32_166 : i32
    %413 = arith.select %412, %411, %355 : vector<8x32xf32>
    %414 = arith.select %412, %409, %356 : vector<8x32xf32>
    %c7_i32_167 = arith.constant 7 : i32
    %c7_i32_168 = arith.constant 7 : i32
    %415 = arith.minsi %c7_i32_167, %c7_i32_168 : i32
    %c8_i32_169 = arith.constant 8 : i32
    %416 = arith.muli %415, %c8_i32_169 : i32
    %417 = tpu.assume_multiple %416, 8 : i32
    %418 = arith.index_cast %417 : i32 to index
    %c0_170 = arith.constant 0 : index
    %419 = vector.load %arg8[%418, %c0_170] : memref<64x128xf32, #tpu.memory_space<vmem>>, vector<8x128xf32>
    %420 = arith.truncf %382 : vector<8x32xf32> to vector<8x32xbf16>
    %c0_171 = arith.constant 0 : index
    %c0_172 = arith.constant 0 : index
    %c0_173 = arith.constant 0 : index
    %421 = vector.load %arg3[%c0_171, %c0_172, %c0_173] : memref<2x32x128xbf16, #tpu.memory_space<vmem>>, vector<1x32x128xbf16>
    %422 = vector.shape_cast %421 : vector<1x32x128xbf16> to vector<32x128xbf16>
    %cst_174 = arith.constant dense<0.000000e+00> : vector<8x128xf32>
    %423 = tpu.matmul %420, %422, %cst_174 {dimension_numbers = #tpu.dot_dimension_numbers<[1], [0], [0], [1], [0, 0, 1, 1], [], []>} : vector<8x32xbf16>, vector<32x128xbf16>, vector<8x128xf32> -> vector<8x128xf32>
    %424 = arith.addf %419, %423 : vector<8x128xf32>
    %cst_175 = arith.constant 0.000000e+00 : f32
    %425 = vector.broadcast %cst_175 : f32 to vector<8x128xf32>
    %426 = arith.subf %425, %424 : vector<8x128xf32>
    %427 = math.exp %426 : vector<8x128xf32>
    %cst_176 = arith.constant 1.000000e+00 : f32
    %428 = vector.broadcast %cst_176 : f32 to vector<8x128xf32>
    %429 = arith.addf %428, %427 : vector<8x128xf32>
    %430 = tpu.reciprocal %429 {approx = true} : vector<8x128xf32> -> vector<8x128xf32>
    %431 = math.tanh %424 : vector<8x128xf32>
    %432 = vector.extract_strided_slice %430 {offsets = [0, 0], sizes = [8, 32], strides = [1, 1]} : vector<8x128xf32> to vector<8x32xf32>
    %433 = vector.extract_strided_slice %430 {offsets = [0, 32], sizes = [8, 32], strides = [1, 1]} : vector<8x128xf32> to vector<8x32xf32>
    %434 = vector.extract_strided_slice %431 {offsets = [0, 64], sizes = [8, 32], strides = [1, 1]} : vector<8x128xf32> to vector<8x32xf32>
    %435 = vector.extract_strided_slice %430 {offsets = [0, 96], sizes = [8, 32], strides = [1, 1]} : vector<8x128xf32> to vector<8x32xf32>
    %436 = arith.mulf %433, %380 : vector<8x32xf32>
    %437 = arith.mulf %432, %434 : vector<8x32xf32>
    %438 = arith.addf %436, %437 : vector<8x32xf32>
    %439 = math.tanh %438 : vector<8x32xf32>
    %440 = arith.mulf %435, %439 : vector<8x32xf32>
    %441 = arith.truncf %382 : vector<8x32xf32> to vector<8x32xbf16>
    %c0_177 = arith.constant 0 : index
    %c0_178 = arith.constant 0 : index
    %c0_179 = arith.constant 0 : index
    %442 = vector.load %arg2[%c0_177, %c0_178, %c0_179] : memref<1x32x128xbf16, #tpu.memory_space<vmem>>, vector<1x32x128xbf16>
    %443 = vector.shape_cast %442 : vector<1x32x128xbf16> to vector<32x128xbf16>
    %cst_180 = arith.constant dense<0.000000e+00> : vector<8x128xf32>
    %444 = tpu.matmul %441, %443, %cst_180 {dimension_numbers = #tpu.dot_dimension_numbers<[1], [0], [0], [1], [0, 0, 1, 1], [], []>} : vector<8x32xbf16>, vector<32x128xbf16>, vector<8x128xf32> -> vector<8x128xf32>
    %c1_181 = arith.constant 1 : index
    %c0_182 = arith.constant 0 : index
    %c0_183 = arith.constant 0 : index
    %445 = vector.load %arg4[%c1_181, %c0_182, %c0_183] : memref<2x1x128xf32, #tpu.memory_space<vmem>>, vector<1x1x128xf32>
    %446 = vector.shape_cast %445 : vector<1x1x128xf32> to vector<1x128xf32>
    %447 = vector.broadcast %446 : vector<1x128xf32> to vector<8x128xf32>
    %448 = arith.addf %444, %447 : vector<8x128xf32>
    %449 = arith.truncf %413 : vector<8x32xf32> to vector<8x32xbf16>
    %c1_184 = arith.constant 1 : index
    %c0_185 = arith.constant 0 : index
    %c0_186 = arith.constant 0 : index
    %450 = vector.load %arg3[%c1_184, %c0_185, %c0_186] : memref<2x32x128xbf16, #tpu.memory_space<vmem>>, vector<1x32x128xbf16>
    %451 = vector.shape_cast %450 : vector<1x32x128xbf16> to vector<32x128xbf16>
    %cst_187 = arith.constant dense<0.000000e+00> : vector<8x128xf32>
    %452 = tpu.matmul %449, %451, %cst_187 {dimension_numbers = #tpu.dot_dimension_numbers<[1], [0], [0], [1], [0, 0, 1, 1], [], []>} : vector<8x32xbf16>, vector<32x128xbf16>, vector<8x128xf32> -> vector<8x128xf32>
    %453 = arith.addf %448, %452 : vector<8x128xf32>
    %cst_188 = arith.constant 0.000000e+00 : f32
    %454 = vector.broadcast %cst_188 : f32 to vector<8x128xf32>
    %455 = arith.subf %454, %453 : vector<8x128xf32>
    %456 = math.exp %455 : vector<8x128xf32>
    %cst_189 = arith.constant 1.000000e+00 : f32
    %457 = vector.broadcast %cst_189 : f32 to vector<8x128xf32>
    %458 = arith.addf %457, %456 : vector<8x128xf32>
    %459 = tpu.reciprocal %458 {approx = true} : vector<8x128xf32> -> vector<8x128xf32>
    %460 = math.tanh %453 : vector<8x128xf32>
    %461 = vector.extract_strided_slice %459 {offsets = [0, 0], sizes = [8, 32], strides = [1, 1]} : vector<8x128xf32> to vector<8x32xf32>
    %462 = vector.extract_strided_slice %459 {offsets = [0, 32], sizes = [8, 32], strides = [1, 1]} : vector<8x128xf32> to vector<8x32xf32>
    %463 = vector.extract_strided_slice %460 {offsets = [0, 64], sizes = [8, 32], strides = [1, 1]} : vector<8x128xf32> to vector<8x32xf32>
    %464 = vector.extract_strided_slice %459 {offsets = [0, 96], sizes = [8, 32], strides = [1, 1]} : vector<8x128xf32> to vector<8x32xf32>
    %465 = arith.mulf %462, %414 : vector<8x32xf32>
    %466 = arith.mulf %461, %463 : vector<8x32xf32>
    %467 = arith.addf %465, %466 : vector<8x32xf32>
    %468 = math.tanh %467 : vector<8x32xf32>
    %469 = arith.mulf %464, %468 : vector<8x32xf32>
    %c1_i32_190 = arith.constant 1 : i32
    %470 = arith.cmpi sge, %c7_i32_167, %c1_i32_190 : i32
    %471 = arith.select %470, %469, %413 : vector<8x32xf32>
    %472 = arith.select %470, %467, %414 : vector<8x32xf32>
    %c8_i32_191 = arith.constant 8 : i32
    %c7_i32_192 = arith.constant 7 : i32
    %473 = arith.minsi %c8_i32_191, %c7_i32_192 : i32
    %c8_i32_193 = arith.constant 8 : i32
    %474 = arith.muli %473, %c8_i32_193 : i32
    %475 = tpu.assume_multiple %474, 8 : i32
    %476 = arith.index_cast %475 : i32 to index
    %c0_194 = arith.constant 0 : index
    %477 = vector.load %arg8[%476, %c0_194] : memref<64x128xf32, #tpu.memory_space<vmem>>, vector<8x128xf32>
    %478 = arith.truncf %440 : vector<8x32xf32> to vector<8x32xbf16>
    %c0_195 = arith.constant 0 : index
    %c0_196 = arith.constant 0 : index
    %c0_197 = arith.constant 0 : index
    %479 = vector.load %arg3[%c0_195, %c0_196, %c0_197] : memref<2x32x128xbf16, #tpu.memory_space<vmem>>, vector<1x32x128xbf16>
    %480 = vector.shape_cast %479 : vector<1x32x128xbf16> to vector<32x128xbf16>
    %cst_198 = arith.constant dense<0.000000e+00> : vector<8x128xf32>
    %481 = tpu.matmul %478, %480, %cst_198 {dimension_numbers = #tpu.dot_dimension_numbers<[1], [0], [0], [1], [0, 0, 1, 1], [], []>} : vector<8x32xbf16>, vector<32x128xbf16>, vector<8x128xf32> -> vector<8x128xf32>
    %482 = arith.addf %477, %481 : vector<8x128xf32>
    %cst_199 = arith.constant 0.000000e+00 : f32
    %483 = vector.broadcast %cst_199 : f32 to vector<8x128xf32>
    %484 = arith.subf %483, %482 : vector<8x128xf32>
    %485 = math.exp %484 : vector<8x128xf32>
    %cst_200 = arith.constant 1.000000e+00 : f32
    %486 = vector.broadcast %cst_200 : f32 to vector<8x128xf32>
    %487 = arith.addf %486, %485 : vector<8x128xf32>
    %488 = tpu.reciprocal %487 {approx = true} : vector<8x128xf32> -> vector<8x128xf32>
    %489 = math.tanh %482 : vector<8x128xf32>
    %490 = vector.extract_strided_slice %488 {offsets = [0, 0], sizes = [8, 32], strides = [1, 1]} : vector<8x128xf32> to vector<8x32xf32>
    %491 = vector.extract_strided_slice %488 {offsets = [0, 32], sizes = [8, 32], strides = [1, 1]} : vector<8x128xf32> to vector<8x32xf32>
    %492 = vector.extract_strided_slice %489 {offsets = [0, 64], sizes = [8, 32], strides = [1, 1]} : vector<8x128xf32> to vector<8x32xf32>
    %493 = vector.extract_strided_slice %488 {offsets = [0, 96], sizes = [8, 32], strides = [1, 1]} : vector<8x128xf32> to vector<8x32xf32>
    %494 = arith.mulf %491, %438 : vector<8x32xf32>
    %495 = arith.mulf %490, %492 : vector<8x32xf32>
    %496 = arith.addf %494, %495 : vector<8x32xf32>
    %497 = math.tanh %496 : vector<8x32xf32>
    %498 = arith.mulf %493, %497 : vector<8x32xf32>
    %499 = arith.truncf %440 : vector<8x32xf32> to vector<8x32xbf16>
    %c0_201 = arith.constant 0 : index
    %c0_202 = arith.constant 0 : index
    %c0_203 = arith.constant 0 : index
    %500 = vector.load %arg2[%c0_201, %c0_202, %c0_203] : memref<1x32x128xbf16, #tpu.memory_space<vmem>>, vector<1x32x128xbf16>
    %501 = vector.shape_cast %500 : vector<1x32x128xbf16> to vector<32x128xbf16>
    %cst_204 = arith.constant dense<0.000000e+00> : vector<8x128xf32>
    %502 = tpu.matmul %499, %501, %cst_204 {dimension_numbers = #tpu.dot_dimension_numbers<[1], [0], [0], [1], [0, 0, 1, 1], [], []>} : vector<8x32xbf16>, vector<32x128xbf16>, vector<8x128xf32> -> vector<8x128xf32>
    %c1_205 = arith.constant 1 : index
    %c0_206 = arith.constant 0 : index
    %c0_207 = arith.constant 0 : index
    %503 = vector.load %arg4[%c1_205, %c0_206, %c0_207] : memref<2x1x128xf32, #tpu.memory_space<vmem>>, vector<1x1x128xf32>
    %504 = vector.shape_cast %503 : vector<1x1x128xf32> to vector<1x128xf32>
    %505 = vector.broadcast %504 : vector<1x128xf32> to vector<8x128xf32>
    %506 = arith.addf %502, %505 : vector<8x128xf32>
    %507 = arith.truncf %471 : vector<8x32xf32> to vector<8x32xbf16>
    %c1_208 = arith.constant 1 : index
    %c0_209 = arith.constant 0 : index
    %c0_210 = arith.constant 0 : index
    %508 = vector.load %arg3[%c1_208, %c0_209, %c0_210] : memref<2x32x128xbf16, #tpu.memory_space<vmem>>, vector<1x32x128xbf16>
    %509 = vector.shape_cast %508 : vector<1x32x128xbf16> to vector<32x128xbf16>
    %cst_211 = arith.constant dense<0.000000e+00> : vector<8x128xf32>
    %510 = tpu.matmul %507, %509, %cst_211 {dimension_numbers = #tpu.dot_dimension_numbers<[1], [0], [0], [1], [0, 0, 1, 1], [], []>} : vector<8x32xbf16>, vector<32x128xbf16>, vector<8x128xf32> -> vector<8x128xf32>
    %511 = arith.addf %506, %510 : vector<8x128xf32>
    %cst_212 = arith.constant 0.000000e+00 : f32
    %512 = vector.broadcast %cst_212 : f32 to vector<8x128xf32>
    %513 = arith.subf %512, %511 : vector<8x128xf32>
    %514 = math.exp %513 : vector<8x128xf32>
    %cst_213 = arith.constant 1.000000e+00 : f32
    %515 = vector.broadcast %cst_213 : f32 to vector<8x128xf32>
    %516 = arith.addf %515, %514 : vector<8x128xf32>
    %517 = tpu.reciprocal %516 {approx = true} : vector<8x128xf32> -> vector<8x128xf32>
    %518 = math.tanh %511 : vector<8x128xf32>
    %519 = vector.extract_strided_slice %517 {offsets = [0, 0], sizes = [8, 32], strides = [1, 1]} : vector<8x128xf32> to vector<8x32xf32>
    %520 = vector.extract_strided_slice %517 {offsets = [0, 32], sizes = [8, 32], strides = [1, 1]} : vector<8x128xf32> to vector<8x32xf32>
    %521 = vector.extract_strided_slice %518 {offsets = [0, 64], sizes = [8, 32], strides = [1, 1]} : vector<8x128xf32> to vector<8x32xf32>
    %522 = vector.extract_strided_slice %517 {offsets = [0, 96], sizes = [8, 32], strides = [1, 1]} : vector<8x128xf32> to vector<8x32xf32>
    %523 = arith.mulf %520, %472 : vector<8x32xf32>
    %524 = arith.mulf %519, %521 : vector<8x32xf32>
    %525 = arith.addf %523, %524 : vector<8x32xf32>
    %526 = math.tanh %525 : vector<8x32xf32>
    %527 = arith.mulf %522, %526 : vector<8x32xf32>
    %c1_i32_214 = arith.constant 1 : i32
    %528 = arith.cmpi sge, %c8_i32_191, %c1_i32_214 : i32
    %529 = arith.select %528, %527, %471 : vector<8x32xf32>
    %530 = arith.select %528, %525, %472 : vector<8x32xf32>
    %c9_i32 = arith.constant 9 : i32
    %531 = arith.truncf %529 : vector<8x32xf32> to vector<8x32xbf16>
    %c0_215 = arith.constant 0 : index
    %c0_216 = arith.constant 0 : index
    %532 = vector.load %arg5[%c0_215, %c0_216] : memref<32x3xbf16, #tpu.memory_space<vmem>>, vector<32x3xbf16>
    %cst_217 = arith.constant dense<0.000000e+00> : vector<8x3xf32>
    %533 = tpu.matmul %531, %532, %cst_217 {dimension_numbers = #tpu.dot_dimension_numbers<[1], [0], [0], [1], [0, 0, 1, 1], [], []>} : vector<8x32xbf16>, vector<32x3xbf16>, vector<8x3xf32> -> vector<8x3xf32>
    %c0_218 = arith.constant 0 : index
    %c0_219 = arith.constant 0 : index
    %534 = vector.load %arg6[%c0_218, %c0_219] : memref<1x3xf32, #tpu.memory_space<vmem>>, vector<1x3xf32>
    %535 = vector.broadcast %534 : vector<1x3xf32> to vector<8x3xf32>
    %536 = arith.addf %533, %535 : vector<8x3xf32>
    %c0_220 = arith.constant 0 : index
    %c0_221 = arith.constant 0 : index
    %537 = vector.load %arg7[%c0_220, %c0_221] : memref<8x3xf32, #tpu.memory_space<vmem>>, vector<8x3xf32>
    tpu.vector_store %arg7[%c0_220, %c0_221], %536 {strides = array<i32>} : memref<8x3xf32, #tpu.memory_space<vmem>>, vector<8x3xf32>,
    return
  }
}

</mosaic_0001>

<bundles_post_ra>
// kernel: lstm_model_apply.1
= control target key start
LH: loop header
LB: loop body
LE: loop exit
PB: predicated region body
PF: predicated region fallthrough
CT: control target
= control target key end

     0   :  { %vm76_vm0 = vcmask 1041408   ;;  %vm63_vm1 = vcmask 31744   ;;  %v2243_v1 = vmov 0.0   ;;  %vm2244_vm2 = vmmov 0   ;;  %s2246_s12 = smov 64   ;;  %s2247_s13 = smov 32   ;;  %s2694_s1 = inlined_call_operand.vmem [shape: bf16[4,128], index: 1, kind: input, shape index: {}]   ;;  %s2695_s3 = inlined_call_operand.vmem [shape: bf16[2,32,128], index: 3, kind: input, shape index: {}]   ;;  %s2696_s0 = inlined_call_operand.vmem [shape: bf16[64,4], index: 0, kind: input, shape index: {}]   ;;  %s2697_s4 = inlined_call_operand.vmem [shape: f32[2,1,128], index: 4, kind: input, shape index: {}]   ;;  %s2698_s2 = inlined_call_operand.vmem [shape: bf16[1,32,128], index: 2, kind: input, shape index: {}]   ;;  %s2699_s5 = inlined_call_operand.vmem [shape: bf16[32,3], index: 5, kind: input, shape index: {}]   ;;  %s2700_s6 = inlined_call_operand.vmem [shape: f32[1,3], index: 6, kind: input, shape index: {}]   ;;  %s2701_s7 = inlined_call_operand.vmem [shape: f32[8,3], index: 7, kind: output, shape index: {}]  }
   0x1   :  { %v35_v0 = vld [vmem:[%s2694_s1] sm:$0x3]  ;;  %1891 = vmatprep.subr.bf16.mxu1 %v2243_v1  ;;  %1895 = vmatprep.mubr.msk.bf16.mxu1 %vm2244_vm2, %v2243_v1  ;;  %v2297_v3 = vld [vmem:[%s2695_s3 + $0x8] sm:$0xff]   ;;  %v2245_v7 = vmov 0   ;;  %v2102_v28 = vld [vmem:[%s2696_s0 + $0x10] sm:$0xff]   ;;  %vm170_vm3 = vcmask 261120  }
   0x2   :  { %2091 = vmatprep.subr.msk.bf16.mxu0 %vm76_vm0, %v35_v0  ;;  %v78_v2 = vsel %vm76_vm0, %v35_v0, 0  ;;  %v2098_v4 = vld [vmem:[%s2696_s0] sm:$0xff]   ;;  %1892 = vmatpush3.bf16.msra.mxu1 %v2297_v3  ;;  %v2099_v5 = vld [vmem:[%s2696_s0 + $0x8] sm:$0xff]   ;;  %v2103_v29 = vld [vmem:[%s2696_s0 + $0x18] sm:$0xff]   ;;  %vm1748_vm4 = vcmask 23552  }
   0x3   :  { %1882 = vmatpush3.bf16.msra.mxu0 %v78_v2  ;;  %1883 = vmatprep.mubr.msk.bf16.mxu0 %vm63_vm1, %v2098_v4  ;;  %v2312_v6 = vld [vmem:[%s2695_s3] sm:$0xff]   ;;  %v2346_v30 = vld [vmem:[%s2698_s2 + $0x8] sm:$0xff]   ;;  %v2366_v36 = vld [vmem:[%s2695_s3 + $0x18] sm:$0xff]  }
   0x4   :  { %1907 = vmatprep.subr.bf16.mxu0 %v2243_v1  ;;  %1893 = vmatprep.subr.bf16.mxu1 %v2243_v1  ;;  %v2329_v9 = vld [vmem:[%s2697_s4] ss:$0 sm:$0xff]  ;;  %v2374_v38 = vld [vmem:[%s2695_s3 + $0x10] sm:$0xff]   ;;  %v2408_v51 = vld [vmem:[%s2697_s4 + $0x1] ss:$0 sm:$0xff] }
   0x5   :  { %v2353_v31 = vld [vmem:[%s2698_s2] sm:$0xff]  }
   0x6   :  { %1884 = vmatmul.mubr.msk.bf16.vlgmr.msra.gmra.mxu0 %vm63_vm1, %v2099_v5  ;;  %1894 = vmatpush3.bf16.msra.mxu1 %v2312_v6 }
   0x7   :  { %1899 = vmatprep.subr.bf16.mxu1 %v2243_v1  ;;  %1887 = vmatprep.mubr.msk.bf16.mxu0 %vm63_vm1, %v2102_v28 }
   0x8   :  { %1908 = vmatpush3.bf16.msra.mxu0 %v2346_v30 }
   0x9   :  { %1896 = vmatmul.mubr.bf16.vlgmr.msra.gmra.mxu1 %v2245_v7  ;;  %1909 = vmatprep.subr.bf16.mxu0 %v2243_v1 }
   0xa   :  { %1900 = vmatpush3.bf16.msra.mxu1 %v2297_v3  ;;  %1903 = vmatprep.mubr.msk.bf16.mxu1 %vm2244_vm2, %v2243_v1 }
   0xb   :  { %1901 = vmatprep.subr.bf16.mxu1 %v2243_v1 }
   0xc   :  { %1910 = vmatpush3.bf16.msra.mxu0 %v2353_v31 }
   0xd   :  { %1923 = vmatprep.subr.bf16.mxu0 %v2243_v1 }
   0xe   :  { %1902 = vmatpush3.bf16.msra.mxu1 %v2312_v6  ;;  %1888 = vmatmul.mubr.msk.bf16.gmra.mxu0 %vm63_vm1, %v2103_v29 }
   0xf   :  { %1915 = vmatprep.subr.bf16.mxu1 %v2243_v1  ;;  %1911 = vmatprep.mubr.msk.bf16.mxu0 %vm2244_vm2, %v2243_v1 }
  0xc6   :  { %v2324_v8 = vpop.f32.mrf.mxu0 }
  0xc8   :  { %v114_v10 = vpop.f32.mrf.mxu0 }
  0xc9   :  { %v115_v11 = vadd.f32 %v2329_v9, %v114_v10  ;;  %v208_v12 = vpop.f32.mrf.mxu1 }
  0xca   :  { %v2394_v39 = vpop.f32.mrf.mxu0 }
  0xcb   :  { %v214_v13 = vadd.f32 %v208_v12, %v115_v11  ;;  %v1897_v14 = vpop.f32.mrf.mxu1 }
  0xcc   :  { %v117_v40 = vpop.f32.mrf.mxu0 }
  0xcd   :  { %2109 = vtanh.f32 %v214_v13  ;;  %v211_v15 = vpop.f32.mrf.mxu1  ;;  %v215_v18 = vsub.f32 0.0, %v214_v13  ;;  %v118_v45 = vadd.f32 %v2329_v9, %v117_v40  ;;  %v123_v40 = vadd.f32 %v2324_v8, %v2329_v9 }
  0xce   :  { %v2396_v41 = vpop.f32.mrf.mxu0 }
  0xcf   :  { %v1898_v16 = vpop.f32.mrf.mxu1  ;;  %v216_v19 = vmul.f32 1.442695, %v215_v18 }
  0xd0   :  { %v2398_v42 = vpop.f32.mrf.mxu0 }
  0xd1   :  { %2111 = vpow2.f32 %v216_v19 }
  0xd2   :  { %v2400_v43 = vpop.f32.mrf.mxu0 }
  0xd4   :  { %v2402_v44 = vpop.f32.mrf.mxu0 }
  0xda   :  { %v2110_v17 = vpop.eup %2109 }
  0xdb   :  { %223 = vrot.lane.b32.xlu0 %v2110_v17, %s2246_s12 }
  0xde   :  { %v2112_v20 = vpop.eup %2111 }
  0xdf   :  { %v218_v21 = vadd.f32 1.0, %v2112_v20 }
  0xe1   :  { %2113 = vrcp.f32 %v218_v21 }
  0xee   :  { %v2114_v22 = vpop.eup %2113 }
  0xef   :  { %v221_v25 = vmul.f32 0.0, %v2114_v22 }
 0x14d   :  { %v224_v23 = vpop.permute.xlu0 %223 }
 0x14e   :  { %v226_v24 = vmul.f32 %v2114_v22, %v224_v23 }
 0x150   :  { %228 = vrot.lane.b32.xlu0 %v226_v24, %s2247_s13 }
 0x1c2   :  { %v229_v26 = vpop.permute.xlu0 %228 }
 0x1c3   :  { %v2334_v27 = vadd.f32 %v229_v26, %v221_v25 }
 0x1c5   :  { %2115 = vtanh.f32 %v2334_v27 }
 0x1d2   :  { %v2116_v32 = vpop.eup %2115 }
 0x1d3   :  { %234 = vrot.lane.b32.xlu1 %v2116_v32, %s2246_s12 }
 0x245   :  { %v235_v33 = vpop.permute.xlu1 %234 }
 0x246   :  { %v237_v34 = vmul.f32 %v2114_v22, %v235_v33 }
 0x248   :  { %v240_v35 = vpack.c.bf16 %v237_v34, %v237_v34 }
 0x24a   :  { %242 = vrot.lane.b32.xlu1 %v240_v35, %s2247_s13 }
 0x2bc   :  { %v243_v37 = vpop.permute.xlu1 %242 }
 0x2bd   :  { %1904 = vmatmul.mubr.msk.bf16.vlgmr.msra.gmra.mxu1 %vm170_vm3, %v243_v37  ;;  %1912 = vmatmul.mubr.msk.bf16.vlgmr.msra.gmra.mxu0 %vm170_vm3, %v243_v37 }
 0x2be   :  { %1916 = vmatpush3.bf16.msra.mxu1 %v2366_v36  ;;  %1919 = vmatprep.mubr.msk.bf16.mxu1 %vm2244_vm2, %v2243_v1 }
 0x2bf   :  { %1917 = vmatprep.subr.bf16.mxu1 %v2243_v1  ;;  %1924 = vmatpush3.bf16.msra.mxu0 %v2297_v3 }
 0x2c0   :  { %1925 = vmatprep.subr.bf16.mxu0 %v2243_v1  ;;  %1927 = vmatprep.mubr.msk.bf16.mxu0 %vm2244_vm2, %v2243_v1 }
 0x2c2   :  { %1918 = vmatpush3.bf16.msra.mxu1 %v2374_v38 }
 0x2c3   :  { %1931 = vmatprep.subr.bf16.mxu1 %v2243_v1  ;;  %1926 = vmatpush3.bf16.msra.mxu0 %v2312_v6 }
 0x2c4   :  { %1939 = vmatprep.subr.bf16.mxu0 %v2243_v1 }
 0x2c5   :  { %1920 = vmatmul.mubr.bf16.vlgmr.msra.gmra.mxu1 %v2245_v7 }
 0x2c6   :  { %1932 = vmatpush3.bf16.msra.mxu1 %v2346_v30  ;;  %1935 = vmatprep.mubr.msk.bf16.mxu1 %vm2244_vm2, %v2243_v1 }
 0x2c7   :  { %1933 = vmatprep.subr.bf16.mxu1 %v2243_v1 }
 0x2ca   :  { %1934 = vmatpush3.bf16.msra.mxu1 %v2353_v31 }
 0x2cb   :  { %1947 = vmatprep.subr.bf16.mxu1 %v2243_v1 }
 0x37d   :  { %v281_v46 = vpop.f32.mrf.mxu1  ;;  %v369_v47 = vpop.f32.mrf.mxu0 }
 0x37e   :  { %v287_v48 = vadd.f32 %v281_v46, %v118_v45  ;;  %v370_v56 = vadd.f32 %v2408_v51, %v369_v47 }
 0x37f   :  { %v1905_v49 = vpop.f32.mrf.mxu1  ;;  %v1913_v50 = vpop.f32.mrf.mxu0 }
 0x380   :  { %2117 = vtanh.f32 %v287_v48  ;;  %v288_v0 = vsub.f32 0.0, %v287_v48 }
 0x381   :  { %v284_v52 = vpop.f32.mrf.mxu1  ;;  %v372_v53 = vpop.f32.mrf.mxu0 }
 0x382   :  { %v289_v2 = vmul.f32 1.442695, %v288_v0 }
 0x383   :  { %v1906_v54 = vpop.f32.mrf.mxu1  ;;  %v1914_v55 = vpop.f32.mrf.mxu0 }
 0x385   :  { %v426_v57 = vpop.f32.mrf.mxu1 }
 0x386   :  { %v432_v58 = vadd.f32 %v426_v57, %v370_v56 }
 0x387   :  { %v1921_v59 = vpop.f32.mrf.mxu1 }
 0x388   :  { %2119 = vtanh.f32 %v432_v58  ;;  %v433_v4 = vsub.f32 0.0, %v432_v58 }
 0x389   :  { %v429_v60 = vpop.f32.mrf.mxu1  ;;  %2121 = vpow2.f32 %v289_v2 }
 0x38a   :  { %v434_v5 = vmul.f32 1.442695, %v433_v4 }
 0x38b   :  { %v1922_v61 = vpop.f32.mrf.mxu1 }
 0x38c   :  { %2123 = vpow2.f32 %v434_v5 }
 0x38d   :  { %v2118_v62 = vpop.eup %2117 }
 0x38e   :  { %296 = vrot.lane.b32.xlu0 %v2118_v62, %s2246_s12 }
 0x395   :  { %v2120_v63 = vpop.eup %2119 }
 0x396   :  { %441 = vrot.lane.b32.xlu1 %v2120_v63, %s2246_s12  ;;  %v2122_v7 = vpop.eup %2121 }
 0x397   :  { %v291_v10 = vadd.f32 1.0, %v2122_v7 }
 0x399   :  { %2125 = vrcp.f32 %v291_v10  ;;  %v2124_v11 = vpop.eup %2123 }
 0x39a   :  { %v436_v12 = vadd.f32 1.0, %v2124_v11 }
 0x39c   :  { %2127 = vrcp.f32 %v436_v12 }
 0x3a6   :  { %v2126_v13 = vpop.eup %2125 }
 0x3a7   :  { %v294_v19 = vmul.f32 %v2126_v13, %v2334_v27 }
 0x3a9   :  { %v2128_v16 = vpop.eup %2127 }
 0x3aa   :  { %v439_v22 = vmul.f32 0.0, %v2128_v16 }
 0x400   :  { %v297_v14 = vpop.permute.xlu0 %296 }
 0x401   :  { %v299_v15 = vmul.f32 %v2126_v13, %v297_v14 }
 0x403   :  { %301 = vrot.lane.b32.xlu0 %v299_v15, %s2247_s13 }
 0x408   :  { %v442_v17 = vpop.permute.xlu1 %441 }
 0x409   :  { %v444_v18 = vmul.f32 %v2128_v16, %v442_v17 }
 0x40b   :  { %446 = vrot.lane.b32.xlu1 %v444_v18, %s2247_s13 }
 0x475   :  { %v302_v20 = vpop.permute.xlu0 %301 }
 0x476   :  { %v2416_v21 = vadd.f32 %v302_v20, %v294_v19 }
 0x478   :  { %2129 = vtanh.f32 %v2416_v21 }
 0x47d   :  { %v447_v23 = vpop.permute.xlu1 %446 }
 0x47e   :  { %v2419_v24 = vadd.f32 %v447_v23, %v439_v22 }
 0x480   :  { %2131 = vtanh.f32 %v2419_v24 }
 0x485   :  { %v2130_v25 = vpop.eup %2129 }
 0x486   :  { %307 = vrot.lane.b32.xlu0 %v2130_v25, %s2246_s12 }
 0x48d   :  { %v2132_v26 = vpop.eup %2131 }
 0x48e   :  { %452 = vrot.lane.b32.xlu1 %v2132_v26, %s2246_s12 }
 0x4f8   :  { %v308_v28 = vpop.permute.xlu0 %307 }
 0x4f9   :  { %v310_v29 = vmul.f32 %v2126_v13, %v308_v28 }
 0x4fb   :  { %v458_v27 = vpack.c.bf16 %v310_v29, %v310_v29 }
 0x4fd   :  { %460 = vrot.lane.b32.xlu0 %v458_v27, %s2247_s13 }
 0x500   :  { %v453_v32 = vpop.permute.xlu1 %452 }
 0x501   :  { %v455_v33 = vmul.f32 %v2128_v16, %v453_v32 }
 0x503   :  { %v569_v34 = vpack.c.bf16 %v455_v33, %v455_v33 }
 0x505   :  { %571 = vrot.lane.b32.xlu1 %v569_v34, %s2247_s13 }
 0x56f   :  { %v461_v35 = vpop.permute.xlu0 %460 }
 0x570   :  { %1928 = vmatmul.mubr.msk.bf16.vlgmr.msra.gmra.mxu0 %vm170_vm3, %v461_v35  ;;  %1936 = vmatmul.mubr.msk.bf16.vlgmr.msra.gmra.mxu1 %vm170_vm3, %v461_v35  ;;  %v126_v35 = vadd.f32 %v2394_v39, %v2329_v9 }
 0x571   :  { %1940 = vmatpush3.bf16.msra.mxu0 %v2366_v36  ;;  %1943 = vmatprep.mubr.msk.bf16.mxu0 %vm2244_vm2, %v2243_v1 }
 0x572   :  { %1941 = vmatprep.subr.bf16.mxu0 %v2243_v1  ;;  %1948 = vmatpush3.bf16.msra.mxu1 %v2297_v3 }
 0x573   :  { %1949 = vmatprep.subr.bf16.mxu1 %v2243_v1  ;;  %1951 = vmatprep.mubr.msk.bf16.mxu1 %vm2244_vm2, %v2243_v1 }
 0x575   :  { %1942 = vmatpush3.bf16.msra.mxu0 %v2374_v38 }
 0x576   :  { %1955 = vmatprep.subr.bf16.mxu0 %v2243_v1  ;;  %1950 = vmatpush3.bf16.msra.mxu1 %v2312_v6 }
 0x577   :  { %v572_v37 = vpop.permute.xlu1 %571  ;;  %1963 = vmatprep.subr.bf16.mxu1 %v2243_v1 }
 0x578   :  { %1944 = vmatmul.mubr.msk.bf16.vlgmr.msra.gmra.mxu0 %vm170_vm3, %v572_v37 }
 0x579   :  { %1956 = vmatpush3.bf16.msra.mxu0 %v2346_v30  ;;  %1959 = vmatprep.mubr.msk.bf16.mxu0 %vm2244_vm2, %v2243_v1 }
 0x57a   :  { %1957 = vmatprep.subr.bf16.mxu0 %v2243_v1 }
 0x57d   :  { %1958 = vmatpush3.bf16.msra.mxu0 %v2353_v31 }
 0x57e   :  { %1971 = vmatprep.subr.bf16.mxu0 %v2243_v1 }
 0x630   :  { %v499_v45 = vpop.f32.mrf.mxu0  ;;  %v563_v46 = vpop.f32.mrf.mxu1 }
 0x631   :  { %v505_v47 = vadd.f32 %v499_v45, %v123_v40  ;;  %v564_v55 = vadd.f32 %v2408_v51, %v563_v46 }
 0x632   :  { %v1929_v48 = vpop.f32.mrf.mxu0  ;;  %v1937_v49 = vpop.f32.mrf.mxu1 }
 0x633   :  { %2133 = vtanh.f32 %v505_v47  ;;  %v506_v62 = vsub.f32 0.0, %v505_v47 }
 0x634   :  { %v502_v50 = vpop.f32.mrf.mxu0  ;;  %v566_v52 = vpop.f32.mrf.mxu1 }
 0x635   :  { %v507_v63 = vmul.f32 1.442695, %v506_v62 }
 0x636   :  { %v1930_v53 = vpop.f32.mrf.mxu0  ;;  %v1938_v54 = vpop.f32.mrf.mxu1 }
 0x638   :  { %v610_v56 = vpop.f32.mrf.mxu0 }
 0x639   :  { %v616_v57 = vadd.f32 %v610_v56, %v564_v55 }
 0x63a   :  { %v1945_v58 = vpop.f32.mrf.mxu0 }
 0x63b   :  { %2135 = vtanh.f32 %v616_v57  ;;  %v617_v0 = vsub.f32 0.0, %v616_v57 }
 0x63c   :  { %v613_v59 = vpop.f32.mrf.mxu0  ;;  %2137 = vpow2.f32 %v507_v63 }
 0x63d   :  { %v618_v2 = vmul.f32 1.442695, %v617_v0 }
 0x63e   :  { %v1946_v60 = vpop.f32.mrf.mxu0 }
 0x63f   :  { %2139 = vpow2.f32 %v618_v2 }
 0x640   :  { %v2134_v61 = vpop.eup %2133 }
 0x641   :  { %514 = vrot.lane.b32.xlu0 %v2134_v61, %s2246_s12 }
 0x648   :  { %v2136_v8 = vpop.eup %2135 }
 0x649   :  { %625 = vrot.lane.b32.xlu1 %v2136_v8, %s2246_s12  ;;  %v2138_v4 = vpop.eup %2137 }
 0x64a   :  { %v509_v5 = vadd.f32 1.0, %v2138_v4 }
 0x64c   :  { %2141 = vrcp.f32 %v509_v5  ;;  %v2140_v7 = vpop.eup %2139 }
 0x64d   :  { %v620_v10 = vadd.f32 1.0, %v2140_v7 }
 0x64f   :  { %2143 = vrcp.f32 %v620_v10 }
 0x659   :  { %v2142_v11 = vpop.eup %2141 }
 0x65a   :  { %v512_v17 = vmul.f32 %v2142_v11, %v2416_v21 }
 0x65c   :  { %v2144_v14 = vpop.eup %2143 }
 0x65d   :  { %v623_v20 = vmul.f32 %v2144_v14, %v2419_v24 }
 0x6b3   :  { %v515_v12 = vpop.permute.xlu0 %514 }
 0x6b4   :  { %v517_v13 = vmul.f32 %v2142_v11, %v515_v12 }
 0x6b6   :  { %519 = vrot.lane.b32.xlu0 %v517_v13, %s2247_s13 }
 0x6bb   :  { %v626_v15 = vpop.permute.xlu1 %625 }
 0x6bc   :  { %v628_v16 = vmul.f32 %v2144_v14, %v626_v15 }
 0x6be   :  { %630 = vrot.lane.b32.xlu1 %v628_v16, %s2247_s13 }
 0x728   :  { %v520_v18 = vpop.permute.xlu0 %519 }
 0x729   :  { %v2455_v19 = vadd.f32 %v520_v18, %v512_v17 }
 0x72b   :  { %2145 = vtanh.f32 %v2455_v19 }
 0x730   :  { %v631_v22 = vpop.permute.xlu1 %630 }
 0x731   :  { %v2459_v23 = vadd.f32 %v631_v22, %v623_v20 }
 0x733   :  { %2147 = vtanh.f32 %v2459_v23 }
 0x738   :  { %v2146_v25 = vpop.eup %2145 }
 0x739   :  { %525 = vrot.lane.b32.xlu0 %v2146_v25, %s2246_s12 }
 0x740   :  { %v2148_v26 = vpop.eup %2147 }
 0x741   :  { %636 = vrot.lane.b32.xlu1 %v2148_v26, %s2246_s12 }
 0x7ab   :  { %v526_v28 = vpop.permute.xlu0 %525 }
 0x7ac   :  { %v528_v21 = vmul.f32 %v2142_v11, %v526_v28 }
 0x7ae   :  { %v642_v29 = vpack.c.bf16 %v528_v21, %v528_v21 }
 0x7b0   :  { %644 = vrot.lane.b32.xlu0 %v642_v29, %s2247_s13 }
 0x7b3   :  { %v637_v27 = vpop.permute.xlu1 %636 }
 0x7b4   :  { %v639_v32 = vmul.f32 %v2144_v14, %v637_v27 }
 0x7b6   :  { %v753_v33 = vpack.c.bf16 %v639_v32, %v639_v32 }
 0x7b8   :  { %755 = vrot.lane.b32.xlu1 %v753_v33, %s2247_s13  ;;  %v131_v33 = vadd.f32 %v2329_v9, %v2398_v42 }
 0x822   :  { %v645_v24 = vpop.permute.xlu0 %644 }
 0x823   :  { %1952 = vmatmul.mubr.msk.bf16.vlgmr.msra.gmra.mxu1 %vm170_vm3, %v645_v24  ;;  %1960 = vmatmul.mubr.msk.bf16.vlgmr.msra.gmra.mxu0 %vm170_vm3, %v645_v24 }
 0x824   :  { %1964 = vmatpush3.bf16.msra.mxu1 %v2366_v36  ;;  %1967 = vmatprep.mubr.msk.bf16.mxu1 %vm2244_vm2, %v2243_v1 }
 0x825   :  { %1965 = vmatprep.subr.bf16.mxu1 %v2243_v1  ;;  %1972 = vmatpush3.bf16.msra.mxu0 %v2297_v3 }
 0x826   :  { %1973 = vmatprep.subr.bf16.mxu0 %v2243_v1  ;;  %1975 = vmatprep.mubr.msk.bf16.mxu0 %vm2244_vm2, %v2243_v1 }
 0x828   :  { %1966 = vmatpush3.bf16.msra.mxu1 %v2374_v38 }
 0x829   :  { %1979 = vmatprep.subr.bf16.mxu1 %v2243_v1  ;;  %1974 = vmatpush3.bf16.msra.mxu0 %v2312_v6 }
 0x82a   :  { %v756_v34 = vpop.permute.xlu1 %755  ;;  %1987 = vmatprep.subr.bf16.mxu0 %v2243_v1 }
 0x82b   :  { %1968 = vmatmul.mubr.msk.bf16.vlgmr.msra.gmra.mxu1 %vm170_vm3, %v756_v34 }
 0x82c   :  { %1980 = vmatpush3.bf16.msra.mxu1 %v2346_v30  ;;  %1983 = vmatprep.mubr.msk.bf16.mxu1 %vm2244_vm2, %v2243_v1 }
 0x82d   :  { %1981 = vmatprep.subr.bf16.mxu1 %v2243_v1 }
 0x830   :  { %1982 = vmatpush3.bf16.msra.mxu1 %v2353_v31 }
 0x831   :  { %1995 = vmatprep.subr.bf16.mxu1 %v2243_v1 }
 0x8e3   :  { %v683_v37 = vpop.f32.mrf.mxu1  ;;  %v747_v40 = vpop.f32.mrf.mxu0 }
 0x8e4   :  { %v689_v45 = vadd.f32 %v683_v37, %v126_v35  ;;  %v748_v53 = vadd.f32 %v2408_v51, %v747_v40 }
 0x8e5   :  { %v1953_v46 = vpop.f32.mrf.mxu1  ;;  %v1961_v47 = vpop.f32.mrf.mxu0 }
 0x8e6   :  { %2149 = vtanh.f32 %v689_v45  ;;  %v690_v60 = vsub.f32 0.0, %v689_v45 }
 0x8e7   :  { %v686_v48 = vpop.f32.mrf.mxu1  ;;  %v750_v49 = vpop.f32.mrf.mxu0 }
 0x8e8   :  { %v691_v61 = vmul.f32 1.442695, %v690_v60 }
 0x8e9   :  { %v1954_v50 = vpop.f32.mrf.mxu1  ;;  %v1962_v52 = vpop.f32.mrf.mxu0 }
 0x8eb   :  { %v794_v54 = vpop.f32.mrf.mxu1 }
 0x8ec   :  { %v800_v55 = vadd.f32 %v794_v54, %v748_v53 }
 0x8ed   :  { %v1969_v56 = vpop.f32.mrf.mxu1 }
 0x8ee   :  { %2151 = vtanh.f32 %v800_v55  ;;  %v801_v8 = vsub.f32 0.0, %v800_v55 }
 0x8ef   :  { %v797_v57 = vpop.f32.mrf.mxu1  ;;  %2153 = vpow2.f32 %v691_v61 }
 0x8f0   :  { %v802_v62 = vmul.f32 1.442695, %v801_v8 }
 0x8f1   :  { %v1970_v58 = vpop.f32.mrf.mxu1 }
 0x8f2   :  { %2155 = vpow2.f32 %v802_v62 }
 0x8f3   :  { %v2150_v59 = vpop.eup %2149 }
 0x8f4   :  { %698 = vrot.lane.b32.xlu0 %v2150_v59, %s2246_s12 }
 0x8fb   :  { %v2152_v39 = vpop.eup %2151 }
 0x8fc   :  { %809 = vrot.lane.b32.xlu1 %v2152_v39, %s2246_s12  ;;  %v2154_v63 = vpop.eup %2153 }
 0x8fd   :  { %v693_v0 = vadd.f32 1.0, %v2154_v63 }
 0x8ff   :  { %2157 = vrcp.f32 %v693_v0  ;;  %v2156_v2 = vpop.eup %2155 }
 0x900   :  { %v804_v4 = vadd.f32 1.0, %v2156_v2 }
 0x902   :  { %2159 = vrcp.f32 %v804_v4 }
 0x90c   :  { %v2158_v5 = vpop.eup %2157 }
 0x90d   :  { %v696_v14 = vmul.f32 %v2158_v5, %v2455_v19 }
 0x90f   :  { %v2160_v11 = vpop.eup %2159 }
 0x910   :  { %v807_v17 = vmul.f32 %v2160_v11, %v2459_v23 }
 0x966   :  { %v699_v7 = vpop.permute.xlu0 %698 }
 0x967   :  { %v701_v10 = vmul.f32 %v2158_v5, %v699_v7 }
 0x969   :  { %703 = vrot.lane.b32.xlu0 %v701_v10, %s2247_s13 }
 0x96e   :  { %v810_v12 = vpop.permute.xlu1 %809 }
 0x96f   :  { %v812_v13 = vmul.f32 %v2160_v11, %v810_v12 }
 0x971   :  { %814 = vrot.lane.b32.xlu1 %v812_v13, %s2247_s13 }
 0x9db   :  { %v704_v15 = vpop.permute.xlu0 %703 }
 0x9dc   :  { %v2495_v16 = vadd.f32 %v704_v15, %v696_v14 }
 0x9de   :  { %2161 = vtanh.f32 %v2495_v16 }
 0x9e3   :  { %v815_v18 = vpop.permute.xlu1 %814 }
 0x9e4   :  { %v2499_v20 = vadd.f32 %v815_v18, %v807_v17 }
 0x9e6   :  { %2163 = vtanh.f32 %v2499_v20 }
 0x9eb   :  { %v2162_v22 = vpop.eup %2161 }
 0x9ec   :  { %709 = vrot.lane.b32.xlu0 %v2162_v22, %s2246_s12 }
 0x9f3   :  { %v2164_v25 = vpop.eup %2163 }
 0x9f4   :  { %820 = vrot.lane.b32.xlu1 %v2164_v25, %s2246_s12 }
 0xa5e   :  { %v710_v26 = vpop.permute.xlu0 %709 }
 0xa5f   :  { %v712_v19 = vmul.f32 %v2158_v5, %v710_v26 }
 0xa61   :  { %v826_v28 = vpack.c.bf16 %v712_v19, %v712_v19 }
 0xa63   :  { %828 = vrot.lane.b32.xlu0 %v826_v28, %s2247_s13 }
 0xa66   :  { %v821_v21 = vpop.permute.xlu1 %820 }
 0xa67   :  { %v823_v29 = vmul.f32 %v2160_v11, %v821_v21 }
 0xa69   :  { %v937_v27 = vpack.c.bf16 %v823_v29, %v823_v29  ;;  %v134_v29 = vadd.f32 %v2329_v9, %v2402_v44 }
 0xa6b   :  { %939 = vrot.lane.b32.xlu1 %v937_v27, %s2247_s13 }
 0xad5   :  { %v829_v23 = vpop.permute.xlu0 %828 }
 0xad6   :  { %1976 = vmatmul.mubr.msk.bf16.vlgmr.msra.gmra.mxu0 %vm170_vm3, %v829_v23  ;;  %1984 = vmatmul.mubr.msk.bf16.vlgmr.msra.gmra.mxu1 %vm170_vm3, %v829_v23 }
 0xad7   :  { %1988 = vmatpush3.bf16.msra.mxu0 %v2366_v36  ;;  %1991 = vmatprep.mubr.msk.bf16.mxu0 %vm2244_vm2, %v2243_v1 }
 0xad8   :  { %1989 = vmatprep.subr.bf16.mxu0 %v2243_v1  ;;  %1996 = vmatpush3.bf16.msra.mxu1 %v2297_v3 }
 0xad9   :  { %1997 = vmatprep.subr.bf16.mxu1 %v2243_v1  ;;  %1999 = vmatprep.mubr.msk.bf16.mxu1 %vm2244_vm2, %v2243_v1 }
 0xadb   :  { %1990 = vmatpush3.bf16.msra.mxu0 %v2374_v38 }
 0xadc   :  { %2003 = vmatprep.subr.bf16.mxu0 %v2243_v1  ;;  %1998 = vmatpush3.bf16.msra.mxu1 %v2312_v6 }
 0xadd   :  { %v940_v32 = vpop.permute.xlu1 %939  ;;  %2011 = vmatprep.subr.bf16.mxu1 %v2243_v1 }
 0xade   :  { %1992 = vmatmul.mubr.msk.bf16.vlgmr.msra.gmra.mxu0 %vm170_vm3, %v940_v32 }
 0xadf   :  { %2004 = vmatpush3.bf16.msra.mxu0 %v2346_v30  ;;  %2007 = vmatprep.mubr.msk.bf16.mxu0 %vm2244_vm2, %v2243_v1 }
 0xae0   :  { %2005 = vmatprep.subr.bf16.mxu0 %v2243_v1 }
 0xae3   :  { %2006 = vmatpush3.bf16.msra.mxu0 %v2353_v31 }
 0xae4   :  { %2019 = vmatprep.subr.bf16.mxu0 %v2243_v1 }
 0xb96   :  { %v867_v24 = vpop.f32.mrf.mxu0  ;;  %v931_v34 = vpop.f32.mrf.mxu1 }
 0xb97   :  { %v873_v35 = vadd.f32 %v867_v24, %v131_v33  ;;  %v932_v49 = vadd.f32 %v2408_v51, %v931_v34 }
 0xb98   :  { %v1977_v37 = vpop.f32.mrf.mxu0  ;;  %v1985_v40 = vpop.f32.mrf.mxu1 }
 0xb99   :  { %2165 = vtanh.f32 %v873_v35  ;;  %v874_v57 = vsub.f32 0.0, %v873_v35 }
 0xb9a   :  { %v870_v45 = vpop.f32.mrf.mxu0  ;;  %v934_v46 = vpop.f32.mrf.mxu1 }
 0xb9b   :  { %v875_v58 = vmul.f32 1.442695, %v874_v57 }
 0xb9c   :  { %v1978_v47 = vpop.f32.mrf.mxu0  ;;  %v1986_v48 = vpop.f32.mrf.mxu1 }
 0xb9e   :  { %v978_v50 = vpop.f32.mrf.mxu0 }
 0xb9f   :  { %v984_v52 = vadd.f32 %v978_v50, %v932_v49 }
 0xba0   :  { %v1993_v53 = vpop.f32.mrf.mxu0 }
 0xba1   :  { %2167 = vtanh.f32 %v984_v52  ;;  %v985_v59 = vsub.f32 0.0, %v984_v52 }
 0xba2   :  { %v981_v54 = vpop.f32.mrf.mxu0  ;;  %2169 = vpow2.f32 %v875_v58 }
 0xba3   :  { %v986_v39 = vmul.f32 1.442695, %v985_v59 }
 0xba4   :  { %v1994_v55 = vpop.f32.mrf.mxu0 }
 0xba5   :  { %2171 = vpow2.f32 %v986_v39 }
 0xba6   :  { %v2166_v56 = vpop.eup %2165 }
 0xba7   :  { %882 = vrot.lane.b32.xlu0 %v2166_v56, %s2246_s12 }
 0xbae   :  { %v2168_v42 = vpop.eup %2167 }
 0xbaf   :  { %993 = vrot.lane.b32.xlu1 %v2168_v42, %s2246_s12  ;;  %v2170_v60 = vpop.eup %2169 }
 0xbb0   :  { %v877_v61 = vadd.f32 1.0, %v2170_v60 }
 0xbb2   :  { %2173 = vrcp.f32 %v877_v61  ;;  %v2172_v8 = vpop.eup %2171 }
 0xbb3   :  { %v988_v62 = vadd.f32 1.0, %v2172_v8 }
 0xbb5   :  { %2175 = vrcp.f32 %v988_v62 }
 0xbbf   :  { %v2174_v63 = vpop.eup %2173 }
 0xbc0   :  { %v880_v10 = vmul.f32 %v2174_v63, %v2495_v16 }
 0xbc2   :  { %v2176_v4 = vpop.eup %2175 }
 0xbc3   :  { %v991_v13 = vmul.f32 %v2176_v4, %v2499_v20 }
 0xc19   :  { %v883_v0 = vpop.permute.xlu0 %882 }
 0xc1a   :  { %v885_v2 = vmul.f32 %v2174_v63, %v883_v0 }
 0xc1c   :  { %887 = vrot.lane.b32.xlu0 %v885_v2, %s2247_s13 }
 0xc21   :  { %v994_v5 = vpop.permute.xlu1 %993 }
 0xc22   :  { %v996_v7 = vmul.f32 %v2176_v4, %v994_v5 }
 0xc24   :  { %998 = vrot.lane.b32.xlu1 %v996_v7, %s2247_s13 }
 0xc8e   :  { %v888_v11 = vpop.permute.xlu0 %887 }
 0xc8f   :  { %v2535_v12 = vadd.f32 %v888_v11, %v880_v10 }
 0xc91   :  { %2177 = vtanh.f32 %v2535_v12 }
 0xc96   :  { %v999_v14 = vpop.permute.xlu1 %998 }
 0xc97   :  { %v2539_v15 = vadd.f32 %v999_v14, %v991_v13 }
 0xc99   :  { %2179 = vtanh.f32 %v2539_v15 }
 0xc9e   :  { %v2178_v17 = vpop.eup %2177 }
 0xc9f   :  { %893 = vrot.lane.b32.xlu0 %v2178_v17, %s2246_s12 }
 0xca6   :  { %v2180_v18 = vpop.eup %2179 }
 0xca7   :  { %1004 = vrot.lane.b32.xlu1 %v2180_v18, %s2246_s12 }
 0xd11   :  { %v894_v22 = vpop.permute.xlu0 %893 }
 0xd12   :  { %v896_v16 = vmul.f32 %v2174_v63, %v894_v22 }
 0xd14   :  { %v1010_v25 = vpack.c.bf16 %v896_v16, %v896_v16 }
 0xd16   :  { %1012 = vrot.lane.b32.xlu0 %v1010_v25, %s2247_s13 }
 0xd19   :  { %v1005_v26 = vpop.permute.xlu1 %1004 }
 0xd1a   :  { %v1007_v19 = vmul.f32 %v2176_v4, %v1005_v26 }
 0xd1c   :  { %v1121_v28 = vpack.c.bf16 %v1007_v19, %v1007_v19 }
 0xd1e   :  { %1123 = vrot.lane.b32.xlu1 %v1121_v28, %s2247_s13 }
 0xd88   :  { %v1013_v20 = vpop.permute.xlu0 %1012 }
 0xd89   :  { %2000 = vmatmul.mubr.msk.bf16.vlgmr.msra.gmra.mxu1 %vm170_vm3, %v1013_v20  ;;  %2008 = vmatmul.mubr.msk.bf16.vlgmr.msra.gmra.mxu0 %vm170_vm3, %v1013_v20 }
 0xd8a   :  { %2012 = vmatpush3.bf16.msra.mxu1 %v2366_v36  ;;  %2015 = vmatprep.mubr.msk.bf16.mxu1 %vm2244_vm2, %v2243_v1 }
 0xd8b   :  { %2013 = vmatprep.subr.bf16.mxu1 %v2243_v1  ;;  %2020 = vmatpush3.bf16.msra.mxu0 %v2297_v3 }
 0xd8c   :  { %2021 = vmatprep.subr.bf16.mxu0 %v2243_v1  ;;  %2023 = vmatprep.mubr.msk.bf16.mxu0 %vm2244_vm2, %v2243_v1 }
 0xd8e   :  { %2014 = vmatpush3.bf16.msra.mxu1 %v2374_v38 }
 0xd8f   :  { %2027 = vmatprep.subr.bf16.mxu1 %v2243_v1  ;;  %2022 = vmatpush3.bf16.msra.mxu0 %v2312_v6 }
 0xd90   :  { %v1124_v21 = vpop.permute.xlu1 %1123  ;;  %2035 = vmatprep.subr.bf16.mxu0 %v2243_v1 }
 0xd91   :  { %2016 = vmatmul.mubr.msk.bf16.vlgmr.msra.gmra.mxu1 %vm170_vm3, %v1124_v21 }
 0xd92   :  { %2028 = vmatpush3.bf16.msra.mxu1 %v2346_v30  ;;  %2031 = vmatprep.mubr.msk.bf16.mxu1 %vm2244_vm2, %v2243_v1 }
 0xd93   :  { %2029 = vmatprep.subr.bf16.mxu1 %v2243_v1 }
 0xd96   :  { %2030 = vmatpush3.bf16.msra.mxu1 %v2353_v31 }
 0xd97   :  { %2043 = vmatprep.subr.bf16.mxu1 %v2243_v1 }
 0xe49   :  { %v1051_v27 = vpop.f32.mrf.mxu1  ;;  %v1115_v23 = vpop.f32.mrf.mxu0 }
 0xe4a   :  { %v1057_v32 = vadd.f32 %v1051_v27, %v134_v29  ;;  %v1116_v45 = vadd.f32 %v2408_v51, %v1115_v23 }
 0xe4b   :  { %v2001_v33 = vpop.f32.mrf.mxu1  ;;  %v2009_v24 = vpop.f32.mrf.mxu0 }
 0xe4c   :  { %2181 = vtanh.f32 %v1057_v32  ;;  %v1058_v53 = vsub.f32 0.0, %v1057_v32 }
 0xe4d   :  { %v1054_v34 = vpop.f32.mrf.mxu1  ;;  %v1118_v35 = vpop.f32.mrf.mxu0 }
 0xe4e   :  { %v1059_v54 = vmul.f32 1.442695, %v1058_v53 }
 0xe4f   :  { %v2002_v37 = vpop.f32.mrf.mxu1  ;;  %v2010_v40 = vpop.f32.mrf.mxu0 }
 0xe51   :  { %v1162_v46 = vpop.f32.mrf.mxu1 }
 0xe52   :  { %v1168_v47 = vadd.f32 %v1162_v46, %v1116_v45 }
 0xe53   :  { %v2017_v48 = vpop.f32.mrf.mxu1 }
 0xe54   :  { %2183 = vtanh.f32 %v1168_v47  ;;  %v1169_v55 = vsub.f32 0.0, %v1168_v47 }
 0xe55   :  { %v1165_v49 = vpop.f32.mrf.mxu1  ;;  %2185 = vpow2.f32 %v1059_v54 }
 0xe56   :  { %v1170_v56 = vmul.f32 1.442695, %v1169_v55 }
 0xe57   :  { %v2018_v50 = vpop.f32.mrf.mxu1 }
 0xe58   :  { %2187 = vpow2.f32 %v1170_v56 }
 0xe59   :  { %v2182_v52 = vpop.eup %2181 }
 0xe5a   :  { %1066 = vrot.lane.b32.xlu0 %v2182_v52, %s2246_s12 }
 0xe61   :  { %v2184_v44 = vpop.eup %2183 }
 0xe62   :  { %1177 = vrot.lane.b32.xlu1 %v2184_v44, %s2246_s12  ;;  %v2186_v42 = vpop.eup %2185 }
 0xe63   :  { %v1061_v57 = vadd.f32 1.0, %v2186_v42 }
 0xe65   :  { %2189 = vrcp.f32 %v1061_v57  ;;  %v2188_v58 = vpop.eup %2187 }
 0xe66   :  { %v1172_v59 = vadd.f32 1.0, %v2188_v58 }
 0xe68   :  { %2191 = vrcp.f32 %v1172_v59 }
 0xe72   :  { %v2190_v39 = vpop.eup %2189 }
 0xe73   :  { %v1064_v0 = vmul.f32 %v2190_v39, %v2535_v12 }
 0xe75   :  { %v2192_v8 = vpop.eup %2191 }
 0xe76   :  { %v1175_v5 = vmul.f32 %v2192_v8, %v2539_v15 }
 0xecc   :  { %v1067_v60 = vpop.permute.xlu0 %1066 }
 0xecd   :  { %v1069_v61 = vmul.f32 %v2190_v39, %v1067_v60 }
 0xecf   :  { %1071 = vrot.lane.b32.xlu0 %v1069_v61, %s2247_s13 }
 0xed4   :  { %v1178_v62 = vpop.permute.xlu1 %1177 }
 0xed5   :  { %v1180_v63 = vmul.f32 %v2192_v8, %v1178_v62 }
 0xed7   :  { %1182 = vrot.lane.b32.xlu1 %v1180_v63, %s2247_s13 }
 0xf41   :  { %v1072_v2 = vpop.permute.xlu0 %1071 }
 0xf42   :  { %v2575_v4 = vadd.f32 %v1072_v2, %v1064_v0 }
 0xf44   :  { %2193 = vtanh.f32 %v2575_v4 }
 0xf49   :  { %v1183_v7 = vpop.permute.xlu1 %1182 }
 0xf4a   :  { %v2579_v10 = vadd.f32 %v1183_v7, %v1175_v5  ;;  %v2237_v7 = vld [vmem:[%s2698_s2 + $0x8] sm:$0xff]  }
 0xf4c   :  { %2195 = vtanh.f32 %v2579_v10 }
 0xf51   :  { %v2194_v11 = vpop.eup %2193 }
 0xf52   :  { %1077 = vrot.lane.b32.xlu0 %v2194_v11, %s2246_s12  ;;  %v2239_v11 = vld [vmem:[%s2695_s3 + $0x18] sm:$0xff]  }
 0xf59   :  { %v2196_v13 = vpop.eup %2195 }
 0xf5a   :  { %1188 = vrot.lane.b32.xlu1 %v2196_v13, %s2246_s12  ;;  %v2241_v13 = vld [vmem:[%s2697_s4] ss:$0 sm:$0xff] }
 0xfc4   :  { %v1078_v14 = vpop.permute.xlu0 %1077 }
 0xfc5   :  { %v1080_v12 = vmul.f32 %v2190_v39, %v1078_v14  ;;  %v142_v14 = vadd.f32 %v2241_v13, %v2400_v43 }
 0xfc7   :  { %v1194_v17 = vpack.c.bf16 %v1080_v12, %v1080_v12 }
 0xfc9   :  { %1196 = vrot.lane.b32.xlu0 %v1194_v17, %s2247_s13 }
 0xfcc   :  { %v1189_v18 = vpop.permute.xlu1 %1188 }
 0xfcd   :  { %v1191_v22 = vmul.f32 %v2192_v8, %v1189_v18 }
 0xfcf   :  { %v1305_v16 = vpack.c.bf16 %v1191_v22, %v1191_v22 }
 0xfd1   :  { %1307 = vrot.lane.b32.xlu1 %v1305_v16, %s2247_s13 }
0x103b   :  { %v1197_v15 = vpop.permute.xlu0 %1196 }
0x103c   :  { %2024 = vmatmul.mubr.msk.bf16.vlgmr.msra.gmra.mxu0 %vm170_vm3, %v1197_v15  ;;  %2032 = vmatmul.mubr.msk.bf16.vlgmr.msra.gmra.mxu1 %vm170_vm3, %v1197_v15 }
0x103d   :  { %2036 = vmatpush3.bf16.msra.mxu0 %v2366_v36  ;;  %2039 = vmatprep.mubr.msk.bf16.mxu0 %vm2244_vm2, %v2243_v1 }
0x103e   :  { %2037 = vmatprep.subr.bf16.mxu0 %v2243_v1  ;;  %2044 = vmatpush3.bf16.msra.mxu1 %v2297_v3  ;;  %v139_v3 = vadd.f32 %v2396_v41, %v2329_v9 }
0x103f   :  { %2045 = vmatprep.subr.bf16.mxu1 %v2243_v1  ;;  %2047 = vmatprep.mubr.msk.bf16.mxu1 %vm2244_vm2, %v2243_v1 }
0x1041   :  { %2038 = vmatpush3.bf16.msra.mxu0 %v2374_v38 }
0x1042   :  { %2051 = vmatprep.subr.bf16.mxu0 %v2243_v1  ;;  %2046 = vmatpush3.bf16.msra.mxu1 %v2312_v6 }
0x1043   :  { %v1308_v25 = vpop.permute.xlu1 %1307  ;;  %2059 = vmatprep.subr.bf16.mxu1 %v2243_v1 }
0x1044   :  { %2040 = vmatmul.mubr.msk.bf16.vlgmr.msra.gmra.mxu0 %vm170_vm3, %v1308_v25 }
0x1045   :  { %2052 = vmatpush3.bf16.msra.mxu0 %v2346_v30  ;;  %2055 = vmatprep.mubr.msk.bf16.mxu0 %vm2244_vm2, %v2243_v1 }
0x1046   :  { %2053 = vmatprep.subr.bf16.mxu0 %v2243_v1 }
0x1049   :  { %2054 = vmatpush3.bf16.msra.mxu0 %v2353_v31 }
0x104a   :  { %2067 = vmatprep.subr.bf16.mxu0 %v2243_v1 }
0x10fc   :  { %v1235_v6 = vpop.f32.mrf.mxu0  ;;  %v1299_v26 = vpop.f32.mrf.mxu1 }
0x10fd   :  { %v1241_v19 = vadd.f32 %v1235_v6, %v139_v3  ;;  %v1300_v23 = vadd.f32 %v2408_v51, %v1299_v26 }
0x10fe   :  { %v2025_v28 = vpop.f32.mrf.mxu0  ;;  %v2033_v20 = vpop.f32.mrf.mxu1 }
0x10ff   :  { %2197 = vtanh.f32 %v1241_v19  ;;  %v1242_v41 = vsub.f32 0.0, %v1241_v19 }
0x1100   :  { %v1238_v21 = vpop.f32.mrf.mxu0  ;;  %v1302_v30 = vpop.f32.mrf.mxu1 }
0x1101   :  { %v1243_v37 = vmul.f32 1.442695, %v1242_v41 }
0x1102   :  { %v2026_v29 = vpop.f32.mrf.mxu0  ;;  %v2034_v27 = vpop.f32.mrf.mxu1 }
0x1104   :  { %v1346_v32 = vpop.f32.mrf.mxu0 }
0x1105   :  { %v1352_v33 = vadd.f32 %v1346_v32, %v1300_v23 }
0x1106   :  { %v2041_v31 = vpop.f32.mrf.mxu0 }
0x1107   :  { %2199 = vtanh.f32 %v1352_v33  ;;  %v1353_v40 = vsub.f32 0.0, %v1352_v33 }
0x1108   :  { %v1349_v24 = vpop.f32.mrf.mxu0  ;;  %2201 = vpow2.f32 %v1243_v37 }
0x1109   :  { %v1354_v45 = vmul.f32 1.442695, %v1353_v40 }
0x110a   :  { %v2042_v34 = vpop.f32.mrf.mxu0 }
0x110b   :  { %2203 = vpow2.f32 %v1354_v45 }
0x110c   :  { %v2198_v35 = vpop.eup %2197 }
0x110d   :  { %1250 = vrot.lane.b32.xlu0 %v2198_v35, %s2246_s12 }
0x1114   :  { %v2200_v9 = vpop.eup %2199 }
0x1115   :  { %1361 = vrot.lane.b32.xlu1 %v2200_v9, %s2246_s12  ;;  %v2202_v46 = vpop.eup %2201 }
0x1116   :  { %v1245_v47 = vadd.f32 1.0, %v2202_v46 }
0x1118   :  { %2205 = vrcp.f32 %v1245_v47  ;;  %v2204_v48 = vpop.eup %2203 }
0x1119   :  { %v1356_v49 = vadd.f32 1.0, %v2204_v48 }
0x111b   :  { %2207 = vrcp.f32 %v1356_v49 }
0x1125   :  { %v2206_v50 = vpop.eup %2205 }
0x1126   :  { %v1248_v56 = vmul.f32 %v2206_v50, %v2575_v4 }
0x1128   :  { %v2208_v53 = vpop.eup %2207 }
0x1129   :  { %v1359_v58 = vmul.f32 %v2208_v53, %v2579_v10 }
0x117f   :  { %v1251_v52 = vpop.permute.xlu0 %1250 }
0x1180   :  { %v1253_v44 = vmul.f32 %v2206_v50, %v1251_v52 }
0x1182   :  { %1255 = vrot.lane.b32.xlu0 %v1253_v44, %s2247_s13 }
0x1187   :  { %v1362_v54 = vpop.permute.xlu1 %1361 }
0x1188   :  { %v1364_v55 = vmul.f32 %v2208_v53, %v1362_v54 }
0x118a   :  { %1366 = vrot.lane.b32.xlu1 %v1364_v55, %s2247_s13 }
0x11f4   :  { %v1256_v42 = vpop.permute.xlu0 %1255 }
0x11f5   :  { %v2615_v57 = vadd.f32 %v1256_v42, %v1248_v56 }
0x11f7   :  { %2209 = vtanh.f32 %v2615_v57 }
0x11fc   :  { %v1367_v59 = vpop.permute.xlu1 %1366 }
0x11fd   :  { %v2619_v39 = vadd.f32 %v1367_v59, %v1359_v58 }
0x11ff   :  { %2211 = vtanh.f32 %v2619_v39 }
0x1204   :  { %v2210_v60 = vpop.eup %2209 }
0x1205   :  { %1261 = vrot.lane.b32.xlu0 %v2210_v60, %s2246_s12 }
0x120c   :  { %v2212_v61 = vpop.eup %2211 }
0x120d   :  { %1372 = vrot.lane.b32.xlu1 %v2212_v61, %s2246_s12 }
0x1277   :  { %v1262_v8 = vpop.permute.xlu0 %1261 }
0x1278   :  { %v1264_v62 = vmul.f32 %v2206_v50, %v1262_v8 }
0x127a   :  { %v1378_v63 = vpack.c.bf16 %v1264_v62, %v1264_v62 }
0x127c   :  { %1380 = vrot.lane.b32.xlu0 %v1378_v63, %s2247_s13  ;;  %v2242_v63 = vld [vmem:[%s2697_s4 + $0x1] ss:$0 sm:$0xff] }
0x127f   :  { %v1373_v0 = vpop.permute.xlu1 %1372 }
0x1280   :  { %v1375_v2 = vmul.f32 %v2208_v53, %v1373_v0 }
0x1282   :  { %v1489_v4 = vpack.c.bf16 %v1375_v2, %v1375_v2 }
0x1284   :  { %1491 = vrot.lane.b32.xlu1 %v1489_v4, %s2247_s13 }
0x12ee   :  { %v1381_v5 = vpop.permute.xlu0 %1380 }
0x12ef   :  { %2048 = vmatmul.mubr.msk.bf16.vlgmr.msra.gmra.mxu1 %vm170_vm3, %v1381_v5  ;;  %2056 = vmatmul.mubr.msk.bf16.vlgmr.msra.gmra.mxu0 %vm170_vm3, %v1381_v5 }
0x12f0   :  { %2060 = vmatpush3.bf16.msra.mxu1 %v2366_v36  ;;  %2063 = vmatprep.mubr.msk.bf16.mxu1 %vm2244_vm2, %v2243_v1  ;;  %v2238_v36 = vld [vmem:[%s2698_s2] sm:$0xff]  }
0x12f1   :  { %2061 = vmatprep.subr.bf16.mxu1 %v2243_v1  ;;  %2068 = vmatpush3.bf16.msra.mxu0 %v2237_v7 }
0x12f2   :  { %2069 = vmatprep.subr.bf16.mxu0 %v2243_v1  ;;  %2071 = vmatprep.mubr.msk.bf16.mxu0 %vm2244_vm2, %v2243_v1 }
0x12f4   :  { %2062 = vmatpush3.bf16.msra.mxu1 %v2374_v38  ;;  %v2240_v38 = vld [vmem:[%s2695_s3 + $0x10] sm:$0xff]  }
0x12f5   :  { %2070 = vmatpush3.bf16.msra.mxu0 %v2238_v36  ;;  %2075 = vmatprep.subr.bf16.mxu1 %v2243_v1 }
0x12f6   :  { %v1492_v10 = vpop.permute.xlu1 %1491  ;;  %2083 = vmatprep.subr.bf16.mxu0 %v2243_v1 }
0x12f7   :  { %2064 = vmatmul.mubr.msk.bf16.vlgmr.msra.gmra.mxu1 %vm170_vm3, %v1492_v10 }
0x12f8   :  { %2076 = vmatpush3.bf16.msra.mxu1 %v2239_v11  ;;  %2079 = vmatprep.mubr.msk.bf16.mxu1 %vm2244_vm2, %v2243_v1 }
0x12f9   :  { %2077 = vmatprep.subr.bf16.mxu1 %v2243_v1 }
0x12fc   :  { %2078 = vmatpush3.bf16.msra.mxu1 %v2240_v38 }
0x13af   :  { %v1419_v12 = vpop.f32.mrf.mxu1  ;;  %v1483_v17 = vpop.f32.mrf.mxu0 }
0x13b0   :  { %v1425_v18 = vadd.f32 %v1419_v12, %v142_v14  ;;  %v1484_v26 = vadd.f32 %v2408_v51, %v1483_v17 }
0x13b1   :  { %v2049_v22 = vpop.f32.mrf.mxu1  ;;  %v2057_v16 = vpop.f32.mrf.mxu0 }
0x13b2   :  { %2213 = vtanh.f32 %v1425_v18  ;;  %v1426_v27 = vsub.f32 0.0, %v1425_v18 }
0x13b3   :  { %v1422_v15 = vpop.f32.mrf.mxu1  ;;  %v1486_v25 = vpop.f32.mrf.mxu0 }
0x13b4   :  { %v1427_v23 = vmul.f32 1.442695, %v1426_v27  ;;  %v2107_v25 = vld [vmem:[%s2699_s5 + $0x8] sm:$0xff]  }
0x13b5   :  { %v2050_v3 = vpop.f32.mrf.mxu1  ;;  %v2058_v6 = vpop.f32.mrf.mxu0 }
0x13b6   :  { %v2108_v3 = vld [vmem:[%s2699_s5] sm:$0xff]  }
0x13b7   :  { %v1530_v19 = vpop.f32.mrf.mxu1 }
0x13b8   :  { %v1536_v28 = vadd.f32 %v1530_v19, %v1484_v26 }
0x13b9   :  { %v2065_v20 = vpop.f32.mrf.mxu1 }
0x13ba   :  { %2215 = vtanh.f32 %v1536_v28  ;;  %v1537_v32 = vsub.f32 0.0, %v1536_v28 }
0x13bb   :  { %v1533_v21 = vpop.f32.mrf.mxu1  ;;  %2217 = vpow2.f32 %v1427_v23 }
0x13bc   :  { %v1538_v33 = vmul.f32 1.442695, %v1537_v32  ;;  %v1797_v21 = vld [vmem:[%s2700_s6] ss:$0 sm:$0xff] }
0x13bd   :  { %v2066_v30 = vpop.f32.mrf.mxu1 }
0x13be   :  { %2219 = vpow2.f32 %v1538_v33 }
0x13bf   :  { %v2214_v29 = vpop.eup %2213 }
0x13c0   :  { %1434 = vrot.lane.b32.xlu0 %v2214_v29, %s2246_s12 }
0x13c7   :  { %v2216_v43 = vpop.eup %2215 }
0x13c8   :  { %1545 = vrot.lane.b32.xlu1 %v2216_v43, %s2246_s12  ;;  %v2218_v31 = vpop.eup %2217 }
0x13c9   :  { %v1429_v51 = vadd.f32 1.0, %v2218_v31 }
0x13cb   :  { %2221 = vrcp.f32 %v1429_v51  ;;  %v2220_v24 = vpop.eup %2219 }
0x13cc   :  { %v1540_v34 = vadd.f32 1.0, %v2220_v24 }
0x13ce   :  { %2223 = vrcp.f32 %v1540_v34 }
0x13d8   :  { %v2222_v35 = vpop.eup %2221 }
0x13d9   :  { %v1432_v46 = vmul.f32 %v2222_v35, %v2615_v57 }
0x13db   :  { %v2224_v37 = vpop.eup %2223 }
0x13dc   :  { %v1543_v49 = vmul.f32 %v2224_v37, %v2619_v39 }
0x1432   :  { %v1435_v9 = vpop.permute.xlu0 %1434 }
0x1433   :  { %v1437_v41 = vmul.f32 %v2222_v35, %v1435_v9 }
0x1435   :  { %1439 = vrot.lane.b32.xlu0 %v1437_v41, %s2247_s13 }
0x143a   :  { %v1546_v40 = vpop.permute.xlu1 %1545 }
0x143b   :  { %v1548_v45 = vmul.f32 %v2224_v37, %v1546_v40 }
0x143d   :  { %1550 = vrot.lane.b32.xlu1 %v1548_v45, %s2247_s13 }
0x14a7   :  { %v1440_v47 = vpop.permute.xlu0 %1439 }
0x14a8   :  { %v1442_v48 = vadd.f32 %v1440_v47, %v1432_v46 }
0x14aa   :  { %2225 = vtanh.f32 %v1442_v48 }
0x14af   :  { %v1551_v50 = vpop.permute.xlu1 %1550 }
0x14b0   :  { %v1553_v52 = vadd.f32 %v1551_v50, %v1543_v49 }
0x14b2   :  { %2227 = vtanh.f32 %v1553_v52 }
0x14b7   :  { %v2226_v44 = vpop.eup %2225 }
0x14b8   :  { %1445 = vrot.lane.b32.xlu0 %v2226_v44, %s2246_s12 }
0x14bf   :  { %v2228_v53 = vpop.eup %2227 }
0x14c0   :  { %1556 = vrot.lane.b32.xlu1 %v2228_v53, %s2246_s12 }
0x152a   :  { %v1446_v54 = vpop.permute.xlu0 %1445 }
0x152b   :  { %v1448_v55 = vmul.f32 %v2222_v35, %v1446_v54 }
0x152d   :  { %v1560_v56 = vpack.c.bf16 %v1448_v55, %v1448_v55 }
0x152f   :  { %1562 = vrot.lane.b32.xlu0 %v1560_v56, %s2247_s13 }
0x1532   :  { %v1557_v42 = vpop.permute.xlu1 %1556 }
0x1533   :  { %v1559_v57 = vmul.f32 %v2224_v37, %v1557_v42 }
0x1535   :  { %v1607_v58 = vpack.c.bf16 %v1559_v57, %v1559_v57 }
0x1537   :  { %1609 = vrot.lane.b32.xlu1 %v1607_v58, %s2247_s13 }
0x15a1   :  { %v1563_v59 = vpop.permute.xlu0 %1562 }
0x15a2   :  { %2072 = vmatmul.mubr.msk.bf16.vlgmr.msra.gmra.mxu0 %vm170_vm3, %v1563_v59 }
0x15a3   :  { %2087 = vmatprep.mubr.msk.bf16.mxu0 %vm2244_vm2, %v2243_v1  ;;  %2084 = vmatpush3.bf16.msra.mxu0 %v2107_v25 }
0x15a4   :  { %2085 = vmatprep.subr.bf16.mxu0 %v2243_v1 }
0x15a7   :  { %2086 = vmatpush3.bf16.msra.mxu0 %v2108_v3 }
0x15a9   :  { %v1610_v39 = vpop.permute.xlu1 %1609 }
0x15aa   :  { %2080 = vmatmul.mubr.msk.bf16.vlgmr.msra.gmra.mxu1 %vm170_vm3, %v1610_v39 }
0x1662   :  { %v1601_v60 = vpop.f32.mrf.mxu0 }
0x1663   :  { %v1602_v0 = vadd.f32 %v2242_v63, %v1601_v60 }
0x1664   :  { %v2073_v61 = vpop.f32.mrf.mxu0 }
0x1666   :  { %v1604_v8 = vpop.f32.mrf.mxu0 }
0x1668   :  { %v2074_v62 = vpop.f32.mrf.mxu0 }
0x166a   :  { %v1648_v2 = vpop.f32.mrf.mxu1 }
0x166b   :  { %v1654_v4 = vadd.f32 %v1648_v2, %v1602_v0 }
0x166c   :  { %v2081_v5 = vpop.f32.mrf.mxu1 }
0x166d   :  { %2229 = vtanh.f32 %v1654_v4  ;;  %v1655_v11 = vsub.f32 0.0, %v1654_v4 }
0x166e   :  { %v1651_v7 = vpop.f32.mrf.mxu1 }
0x166f   :  { %v1656_v38 = vmul.f32 1.442695, %v1655_v11 }
0x1670   :  { %v2082_v36 = vpop.f32.mrf.mxu1 }
0x1671   :  { %2231 = vpow2.f32 %v1656_v38 }
0x167a   :  { %v2230_v10 = vpop.eup %2229 }
0x167b   :  { %1663 = vrot.lane.b32.xlu0 %v2230_v10, %s2246_s12 }
0x167e   :  { %v2232_v13 = vpop.eup %2231 }
0x167f   :  { %v1658_v14 = vadd.f32 1.0, %v2232_v13 }
0x1681   :  { %2233 = vrcp.f32 %v1658_v14 }
0x168e   :  { %v2234_v12 = vpop.eup %2233 }
0x168f   :  { %v1661_v22 = vmul.f32 %v2234_v12, %v1553_v52 }
0x16ed   :  { %v1664_v17 = vpop.permute.xlu0 %1663 }
0x16ee   :  { %v1666_v18 = vmul.f32 %v2234_v12, %v1664_v17 }
0x16f0   :  { %1668 = vrot.lane.b32.xlu1 %v1666_v18, %s2247_s13 }
0x1762   :  { %v1669_v16 = vpop.permute.xlu1 %1668 }
0x1763   :  { %v1671_v15 = vadd.f32 %v1669_v16, %v1661_v22 }
0x1765   :  { %2235 = vtanh.f32 %v1671_v15 }
0x1772   :  { %v2236_v6 = vpop.eup %2235 }
0x1773   :  { %1674 = vrot.lane.b32.xlu0 %v2236_v6, %s2246_s12 }
0x17e5   :  { %v1675_v26 = vpop.permute.xlu0 %1674 }
0x17e6   :  { %v1677_v19 = vmul.f32 %v2234_v12, %v1675_v26 }
0x17e8   :  { %v1678_v28 = vpack.c.bf16 %v1677_v19, %v1677_v19 }
0x17ea   :  { %1691 = vrot.lane.b32.xlu1 %v1678_v28, %s2247_s13 }
0x185c   :  { %v1692_v20 = vpop.permute.xlu1 %1691 }
0x185d   :  { %2088 = vmatmul.mubr.msk.bf16.vlgmr.msra.gmra.mxu0 %vm170_vm3, %v1692_v20 }
0x191d   :  { %v1742_v30 = vpop.f32.mrf.mxu0 }
0x191e   :  { %v1743_v29 = vadd.f32 %v1797_v21, %v1742_v30 }
0x191f   :  { %v2089_v1 = vpop.f32.mrf.mxu0 }
0x1920   :  { %1749 = vst.msk [vmem:[%s2701_s7] sm:$0xff] %vm1748_vm4, %v1743_v29 }
0x1921   :  { %v1745_v43 = vpop.f32.mrf.mxu0 }
0x1923   :  { %v2090_v27 = vpop.f32.mrf.mxu0 }

</bundles_post_ra>
